<compile_context>
chip_gen: v5e
topology: v5e:2x2
jax: 0.10.0
libtpu: 0.0.40
codegen_flags: <defaults>
</compile_context>

<pallas_src>
import jax
import jax.numpy as jnp
from jax.experimental import pallas as pl
from jax.experimental.pallas import tpu as pltpu

LRELU_SLOPE = 0.2
BN_EPS = 1e-5
# Per-buffer budget for the bf16 [W1|W3] K tile (double-buffered -> ~5 MB),
# safely inside the default scoped VMEM on v5e (16 MiB) / v6e / v7x (32 MiB).
MAX_W_TILE_BYTES = (5 * 1024 * 1024) // 2


# ---------------------------------------------------------------------------
# helpers
# ---------------------------------------------------------------------------

def _round_up(n, m):
    return ((n + m - 1) // m) * m


def _lrelu(x):
    return jnp.where(x >= 0, x, LRELU_SLOPE * x)


def _pick_k_tiling(ktot, cols, max_tile_bytes):
    """Largest 128-aligned K tile whose bf16 (tk, cols) slab fits the budget."""
    k128 = _round_up(max(ktot, 1), 128)
    bytes_per_row = cols * 2                       # bf16
    cap = max(128, (max_tile_bytes // bytes_per_row) // 128 * 128)
    nk = -(-k128 // cap)                           # cdiv
    tk = _round_up(-(-k128 // nk), 128)
    return tk * nk, tk, nk


# ---------------------------------------------------------------------------
# Fused ResBlock (+ optional head) Pallas kernel
# ---------------------------------------------------------------------------

def resblock_forward(kp, x, eps=None):
    """One fused kernel for
         h    = lrelu((x @ W1) * s1 + b1)           # fc1 + eval bn1
         xin  = lrelu( x @ W3 + b3)                  # fc3 skip
         y    = lrelu((h @ W2) * s2 + b2 + xin)      # fc2 + eval bn2 + residual
       plus optionally fused heads on y:
         head == 'enc': [mu | logvar | z=mu+exp(0.5*logvar)*eps]  (3*Lp lanes)
         head == 'dec': [joint_conf | rot_6D | transl | 0-pad]    (128 lanes)

       x is (Bp, ktot_p) f32; the [W1|W3] slab is K-tiled over a 1-D grid so
       the weight HBM->VMEM stream double-buffers behind the MXU."""
    Bp = x.shape[0]
    tk, nk = kp['tk'], kp['nk']
    Hp, Fp = kp['hp'], kp['fp']
    head = kp['head']
    final_nl = kp['final_nl']
    out_w = kp['out_w']
    Lp = kp.get('lp', None)

    assert x.shape[1] == kp['ktot_p']
    assert (head == 'enc') == (eps is not None)

    def kernel(*refs):
        i = 0
        x_ref = refs[i]; i += 1
        w13_ref = refs[i]; i += 1
        w2_ref = refs[i]; i += 1
        s1_ref = refs[i]; i += 1
        b1_ref = refs[i]; i += 1
        s2_ref = refs[i]; i += 1
        b2_ref = refs[i]; i += 1
        b3_ref = refs[i]; i += 1
        if head is not None:
            wh_ref = refs[i]; i += 1
            bh_ref = refs[i]; i += 1
            if head == 'enc':
                eps_ref = refs[i]; i += 1
        o_ref = refs[i]; i += 1
        acc_ref = refs[i]; i += 1

        k = pl.program_id(0)

        @pl.when(k == 0)
        def _init():
            acc_ref[...] = jnp.zeros_like(acc_ref)

        # single fused matmul per K step: x_tile @ [W1 | W3]
        acc_ref[...] += jnp.dot(x_ref[...].astype(jnp.bfloat16), w13_ref[...],
                                preferred_element_type=jnp.float32)

        @pl.when(k == nk - 1)
        def _finalize():
            acc = acc_ref[...]
            h = _lrelu(acc[:, :Hp] * s1_ref[...] + b1_ref[...])
            xin = _lrelu(acc[:, Hp:] + b3_ref[...])
            y = jnp.dot(h.astype(jnp.bfloat16), w2_ref[...],
                        preferred_element_type=jnp.float32)
            y = y * s2_ref[...] + b2_ref[...] + xin
            if final_nl:
                y = _lrelu(y)
            if head is None:
                o_ref[...] = y.astype(o_ref.dtype)
            else:
                hv = jnp.dot(y.astype(jnp.bfloat16), wh_ref[...],
                             preferred_element_type=jnp.float32) + bh_ref[...]
                if head == 'dec':
                    o_ref[...] = hv.astype(o_ref.dtype)
                else:  # 'enc': mu / logvar / reparameterized z, 128-lane blocks
                    mu = hv[:, :Lp]
                    lv = hv[:, Lp:]
                    z = mu + jnp.exp(0.5 * lv) * eps_ref[...]
                    o_ref[...] = jnp.concatenate([mu, lv, z],
                                                 axis=1).astype(o_ref.dtype)

    stream_x = pl.BlockSpec((Bp, tk), lambda k: (0, k))
    stream_w = pl.BlockSpec((tk, Hp + Fp), lambda k: (k, 0))
    res = lambda shape: pl.BlockSpec(shape, lambda k: (0, 0))

    in_specs = [stream_x, stream_w,
                res((Hp, Fp)),
                res((1, Hp)), res((1, Hp)),
                res((1, Fp)), res((1, Fp)), res((1, Fp))]
    inputs = [x, kp['w13'], kp['w2'],
              kp['s1'], kp['b1'], kp['s2'], kp['b2'], kp['b3']]
    if head is not None:
        cp = kp['wh'].shape[1]
        in_specs += [res((Fp, cp)), res((1, cp))]
        inputs += [kp['wh'], kp['bh']]
        if head == 'enc':
            in_specs += [res((Bp, Lp))]
            inputs += [eps]
    # TODO(synk): residents above are fetched at step 0 although only consumed
    #             in the finalize; deferring them to the last K step is a small
    #             additional win not implemented here.

    return pl.pallas_call(
        kernel,
        out_shape=jax.ShapeDtypeStruct((Bp, out_w), jnp.float32),
        grid=(nk,),
        in_specs=in_specs,
        out_specs=pl.BlockSpec((Bp, out_w), lambda k: (0, 0)),
        scratch_shapes=[pltpu.VMEM((Bp, Hp + Fp), jnp.float32)],
        compiler_params=pltpu.CompilerParams(
            dimension_semantics=("arbitrary",),
            vmem_limit_bytes=32 * 1024 * 1024),
    )(*inputs)


# ---------------------------------------------------------------------------
# Synthetic PyTorch-shaped parameters + kernel-side parameter prep
# ---------------------------------------------------------------------------

def init_linear(key, fin, fout):
    kw, kb = jax.random.split(key)
    bound = 1.0 / jnp.sqrt(jnp.float32(fin))
    return {'w': jax.random.uniform(kw, (fin, fout), jnp.float32, -bound, bound),
            'b': jax.random.uniform(kb, (fout,), jnp.float32, -bound, bound)}


def init_bn(key, f):
    """Eval-mode BatchNorm1d reduced to per-feature scale/shift (running stats)."""
    k1, k2, k3, k4 = jax.random.split(key, 4)
    gamma = 1.0 + 0.1 * jax.random.normal(k1, (f,), jnp.float32)
    beta = 0.1 * jax.random.normal(k2, (f,), jnp.float32)
    rmean = 0.1 * jax.random.normal(k3, (f,), jnp.float32)
    rvar = 1.0 + 0.1 * jnp.abs(jax.random.normal(k4, (f,), jnp.float32))
    scale = gamma / jnp.sqrt(rvar + BN_EPS)
    shift = beta - rmean * scale
    return {'scale': scale, 'shift': shift}


def init_resblock(key, fin, fout, hidden):
    keys = jax.random.split(key, 5)
    p = {'fc1': init_linear(keys[0], fin, hidden),
         'bn1': init_bn(keys[1], hidden),
         'fc2': init_linear(keys[2], hidden, fout),
         'bn2': init_bn(keys[3], fout)}
    if fin != fout:
        p['fc3'] = init_linear(keys[4], fin, fout)
    return p


def init_ffhgenerator(key, n_neurons, in_bps, in_pose, latent_d, rb_hidden):
    keys = jax.random.split(key, 11)
    return {
        'enc_bn1': init_bn(keys[0], in_bps + in_pose),
        'enc_rb1': init_resblock(keys[1], in_bps + in_pose, n_neurons, rb_hidden),
        'enc_rb2': init_resblock(keys[2], n_neurons + in_bps + in_pose, n_neurons, rb_hidden),
        'enc_mu': init_linear(keys[3], n_neurons, latent_d),
        'enc_logvar': init_linear(keys[4], n_neurons, latent_d),
        'dec_bn1': init_bn(keys[5], in_bps),
        'dec_rb1': init_resblock(keys[6], latent_d + in_bps, n_neurons, rb_hidden),
        'dec_rb2': init_resblock(keys[7], n_neurons + latent_d + in_bps, n_neurons, rb_hidden),
        'dec_joint_conf': init_linear(keys[8], n_neurons, 15),
        'dec_rot': init_linear(keys[9], n_neurons, 6),
        'dec_transl': init_linear(keys[10], n_neurons, 3),
    }


def prep_resblock(rb, row_segments, head=None, final_nl=True,
                  max_tile_bytes=MAX_W_TILE_BYTES):
    """Build the fused [W1|W3] K-streamed slab + f32 BN scale/shift vectors.

    row_segments: list of (raw_rows, padded_rows) in the exact order the
    wrapper concatenates the input activations (matches torch.cat([X0, X]))."""
    w1, b1 = rb['fc1']['w'], rb['fc1']['b']           # (Fin, H), (H,)
    w2, b2 = rb['fc2']['w'], rb['fc2']['b']           # (H, Fout), (Fout,)
    w3, b3 = rb['fc3']['w'], rb['fc3']['b']           # (Fin, Fout), (Fout,)
    H, Fout = w2.shape
    Hp, Fp = _round_up(H, 128), _round_up(Fout, 128)

    # eval-mode bn1/bn2 as per-column scale/shift applied in f32 in finalize
    s1, t1 = rb['bn1']['scale'], rb['bn1']['shift']
    s2, t2 = rb['bn2']['scale'], rb['bn2']['shift']
    b1_eff = b1 * s1 + t1
    b2_eff = b2 * s2 + t2

    pad_cols = lambda a, n: jnp.pad(a, ((0, 0), (0, n - a.shape[1])))
    w13 = jnp.concatenate([pad_cols(w1, Hp), pad_cols(w3, Fp)], axis=1)

    # lay out the weight rows to match the wrapper-side activation concat
    parts, r = [], 0
    for raw, padded in row_segments:
        parts.append(w13[r:r + raw])
        if padded > raw:
            parts.append(jnp.zeros((padded - raw, w13.shape[1]), w13.dtype))
        r += raw
    assert r == w13.shape[0]
    w13 = jnp.concatenate(parts, axis=0)
    ktot = w13.shape[0]
    ktot_p, tk, nk = _pick_k_tiling(ktot, Hp + Fp, max_tile_bytes)
    w13 = jnp.pad(w13, ((0, ktot_p - ktot), (0, 0)))

    pad_vec = lambda v, n: jnp.pad(v, (0, n - v.shape[0])).reshape(1, -1)
    kp = {
        'hp': Hp, 'fp': Fp, 'ktot_p': ktot_p, 'tk': tk, 'nk': nk,
        'final_nl': final_nl, 'head': None,
        'w13': w13.astype(jnp.bfloat16),
        'w2': jnp.pad(w2, ((0, Hp - H), (0, Fp - Fout))).astype(jnp.bfloat16),
        's1': pad_vec(s1, Hp).astype(jnp.float32),
        'b1': pad_vec(b1_eff, Hp).astype(jnp.float32),
        's2': pad_vec(s2, Fp).astype(jnp.float32),
        'b2': pad_vec(b2_eff, Fp).astype(jnp.float32),
        'b3': pad_vec(b3, Fp).astype(jnp.float32),
        'out_w': Fp,
    }

    if head is not None:
        kind = head[0]
        kp['head'] = kind
        if kind == 'enc':
            w_mu, b_mu, w_lv, b_lv, L = head[1:]
            Lp = _round_up(L, 128)
            wh = jnp.zeros((Fp, 2 * Lp), jnp.float32)
            wh = wh.at[:Fout, :L].set(w_mu)
            wh = wh.at[:Fout, Lp:Lp + L].set(w_lv)
            bh = jnp.zeros((1, 2 * Lp), jnp.float32)
            bh = bh.at[0, :L].set(b_mu)
            bh = bh.at[0, Lp:Lp + L].set(b_lv)
            kp['lp'] = Lp
            kp['out_w'] = 3 * Lp                 # [mu | logvar | z] lane blocks
        else:  # 'dec'
            heads = head[1]                      # [(w, b), ...] in output order
            cols = sum(w.shape[1] for w, _ in heads)
            Cp = _round_up(cols, 128)
            wh = jnp.zeros((Fp, Cp), jnp.float32)
            bh = jnp.zeros((1, Cp), jnp.float32)
            c = 0
            for w, b in heads:
                n = w.shape[1]
                wh = wh.at[:Fout, c:c + n].set(w)
                bh = bh.at[0, c:c + n].set(b)
                c += n
            kp['out_w'] = Cp
        kp['wh'] = wh.astype(jnp.bfloat16)
        kp['bh'] = bh.astype(jnp.float32)
    return kp


def prepare_params(raw, latent_d, max_w_tile_bytes=MAX_W_TILE_BYTES):
    f_enc = raw['enc_bn1']['scale'].shape[0]              # in_bps + in_pose
    in_bps = raw['dec_bn1']['scale'].shape[0]
    n_neurons = raw['enc_rb1']['fc2']['w'].shape[1]
    fp = _round_up(n_neurons, 128)
    f_dec = latent_d + in_bps

    return {
        'latent_d': latent_d,
        'lp': _round_up(latent_d, 128),
        'enc_bn1_scale': raw['enc_bn1']['scale'],
        'enc_bn1_shift': raw['enc_bn1']['shift'],
        'dec_bn1_scale': raw['dec_bn1']['scale'],
        'dec_bn1_shift': raw['dec_bn1']['shift'],
        # NOTE: segment order is [X0, X] exactly as torch.cat([X0, X], dim=1).
        'enc_rb1': prep_resblock(raw['enc_rb1'], [(f_enc, f_enc)],
                                 max_tile_bytes=max_w_tile_bytes),
        'enc_rb2': prep_resblock(
            raw['enc_rb2'], [(f_enc, f_enc), (n_neurons, fp)],
            head=('enc', raw['enc_mu']['w'], raw['enc_mu']['b'],
                  raw['enc_logvar']['w'], raw['enc_logvar']['b'], latent_d),
            max_tile_bytes=max_w_tile_bytes),
        'dec_rb1': prep_resblock(raw['dec_rb1'], [(f_dec, f_dec)],
                                 max_tile_bytes=max_w_tile_bytes),
        'dec_rb2': prep_resblock(
            raw['dec_rb2'], [(f_dec, f_dec), (n_neurons, fp)],
            head=('dec', [(raw['dec_joint_conf']['w'], raw['dec_joint_conf']['b']),
                          (raw['dec_rot']['w'], raw['dec_rot']['b']),
                          (raw['dec_transl']['w'], raw['dec_transl']['b'])]),
            max_tile_bytes=max_w_tile_bytes),
    }


# ---------------------------------------------------------------------------
# Model forward (glue in plain JAX, hot path in 4 fused Pallas kernels)
# ---------------------------------------------------------------------------

def ffhgenerator_forward(prep, data, eps):
    bps = data['bps_object'].astype(jnp.float32)
    B = bps.shape[0]
    rot = data['rot_matrix'].reshape(B, -1).astype(jnp.float32)   # set_input view(bs,-1)
    X = jnp.concatenate([bps, rot, data['transl'].astype(jnp.float32),
                         data['joint_conf'].astype(jnp.float32)], axis=1)

    Bp = _round_up(B, 8)                                          # f32 sublane align
    pad_b = (lambda a: a) if Bp == B else (lambda a: jnp.pad(a, ((0, Bp - B), (0, 0))))
    pad_k = lambda a, kp: jnp.pad(a, ((0, 0), (0, kp['ktot_p'] - a.shape[1])))

    L, Lp = prep['latent_d'], prep['lp']

    # eval-mode input BN (tiny elementwise op; keeps kernel weights un-scaled)
    X0 = pad_b(X * prep['enc_bn1_scale'] + prep['enc_bn1_shift'])
    eps_p = jnp.zeros((Bp, Lp), jnp.float32).at[:B, :L].set(eps.astype(jnp.float32))

    # ---- encoder ----
    h1 = resblock_forward(prep['enc_rb1'], pad_k(X0, prep['enc_rb1']))
    enc_slab = resblock_forward(
        prep['enc_rb2'],
        pad_k(jnp.concatenate([X0, h1], axis=1), prep['enc_rb2']),
        eps=eps_p)                                                # [mu|logvar|z]
    mu = enc_slab[:B, :L]
    logvar = enc_slab[:B, Lp:Lp + L]
    z_full = enc_slab[:, 2 * Lp:2 * Lp + L]                       # keep padded rows

    # ---- decoder ----
    o_bps = pad_b(bps * prep['dec_bn1_scale'] + prep['dec_bn1_shift'])
    Y0 = jnp.concatenate([z_full, o_bps], axis=1)
    g1 = resblock_forward(prep['dec_rb1'], pad_k(Y0, prep['dec_rb1']))
    dec_slab = resblock_forward(
        prep['dec_rb2'],
        pad_k(jnp.concatenate([Y0, g1], axis=1), prep['dec_rb2']))

    return {
        'mu': mu, 'logvar': logvar, 'z': z_full[:B],
        'joint_conf': dec_slab[:B, 0:15],
        'rot_6D': dec_slab[:B, 15:21],
        'transl': dec_slab[:B, 21:24],
    }


# ---------------------------------------------------------------------------
# Plain-JAX eval-mode reference for correctness checking
# ---------------------------------------------------------------------------

def reference_forward(raw, data, eps):
    def bn(x, p): return x * p['scale'] + p['shift']
    def lin(x, p): return x @ p['w'] + p['b']

    def rb(p, x, final_nl=True):
        xin = _lrelu(lin(x, p['fc3'])) if 'fc3' in p else x
        h = _lrelu(bn(lin(x, p['fc1']), p['bn1']))
        y = bn(lin(h, p['fc2']), p['bn2']) + xin
        return _lrelu(y) if final_nl else y

    bps = data['bps_object']
    B = bps.shape[0]
    rot = data['rot_matrix'].reshape(B, -1)
    X = jnp.concatenate([bps, rot, data['transl'], data['joint_conf']], axis=1)
    X0 = bn(X, raw['enc_bn1'])
    X1 = rb(raw['enc_rb1'], X0)
    X2 = rb(raw['enc_rb2'], jnp.concatenate([X0, X1], axis=1))
    mu, logvar = lin(X2, raw['enc_mu']), lin(X2, raw['enc_logvar'])
    z = mu + jnp.exp(0.5 * logvar) * eps

    Y0 = jnp.concatenate([z, bn(bps, raw['dec_bn1'])], axis=1)
    Y1 = rb(raw['dec_rb1'], Y0)
    Y2 = rb(raw['dec_rb2'], jnp.concatenate([Y0, Y1], axis=1))
    return {'mu': mu, 'logvar': logvar, 'z': z,
            'joint_conf': lin(Y2, raw['dec_joint_conf']),
            'rot_6D': lin(Y2, raw['dec_rot']),
            'transl': lin(Y2, raw['dec_transl'])}


# ---------------------------------------------------------------------------

if __name__ == "__main__":
    # Small shapes consistent with the module (real model: in_bps=4096,
    # in_pose=27, n_neurons=512, ResBlock hidden=256, latentD=cfg.latentD).
    B = 4
    IN_BPS = 64
    IN_POSE = 9 + 3 + 15          # rot(9) + transl(3) + joint_conf(15)
    N_NEURONS = 32
    RB_HIDDEN = 48
    LATENT_D = 8

    key = jax.random.PRNGKey(0)
    kparam, kdata, keps = jax.random.split(key, 3)
    raw = init_ffhgenerator(kparam, N_NEURONS, IN_BPS, IN_POSE, LATENT_D, RB_HIDDEN)

    # Tiny per-buffer weight-tile budget so the K-tiled (nk > 1) pipeline path
    # is exercised even at these small test shapes; the default (~2.5 MB/buffer)
    # is what the real model uses (tk=1664, nk=3 per ResBlock).
    prep = prepare_params(raw, LATENT_D, max_w_tile_bytes=64 * 1024)

    k1, k2, k3, k4 = jax.random.split(kdata, 4)
    data = {
        'bps_object': jax.random.normal(k1, (B, IN_BPS), jnp.float32),
        'rot_matrix': jax.random.normal(k2, (B, 3, 3), jnp.float32),
        'transl': jax.random.normal(k3, (B, 3), jnp.float32),
        'joint_conf': jax.random.normal(k4, (B, 15), jnp.float32),
    }
    eps = jax.random.normal(keps, (B, LATENT_D), jnp.float32)

    fwd = jax.jit(lambda d, e: ffhgenerator_forward(prep, d, e))
    out = fwd(data, eps)
    jax.block_until_ready(out)

    assert out['mu'].shape == (B, LATENT_D)
    assert out['logvar'].shape == (B, LATENT_D)
    assert out['z'].shape == (B, LATENT_D)
    assert out['joint_conf'].shape == (B, 15)
    assert out['rot_6D'].shape == (B, 6)
    assert out['transl'].shape == (B, 3)

    # Numerical check against the unfolded eval-mode reference (bf16 weights in
    # the kernels, f32 accumulation and f32 BN scale/shift).
    ref = reference_forward(raw, data, eps)
    for name in ('mu', 'logvar', 'z', 'joint_conf', 'rot_6D', 'transl'):
        err = float(jnp.max(jnp.abs(out[name] - ref[name])))
        assert err < 5e-2, (name, err)

    print("KERNEL_OK")
</pallas_src>

<mosaic_0001>
module attributes {stable_mosaic.version = 11 : i64} {
  func.func @kernel(%arg0: i32, %arg1: memref<8x128xf32, #tpu.memory_space<vmem>>, %arg2: memref<128x256xbf16, #tpu.memory_space<vmem>>, %arg3: memref<128x128xbf16, #tpu.memory_space<vmem>>, %arg4: memref<1x128xf32, #tpu.memory_space<vmem>>, %arg5: memref<1x128xf32, #tpu.memory_space<vmem>>, %arg6: memref<1x128xf32, #tpu.memory_space<vmem>>, %arg7: memref<1x128xf32, #tpu.memory_space<vmem>>, %arg8: memref<1x128xf32, #tpu.memory_space<vmem>>, %arg9: memref<128x256xbf16, #tpu.memory_space<vmem>>, %arg10: memref<1x256xf32, #tpu.memory_space<vmem>>, %arg11: memref<8x128xf32, #tpu.memory_space<vmem>>, %arg12: memref<8x384xf32, #tpu.memory_space<vmem>>, %arg13: memref<8x256xf32, #tpu.memory_space<vmem>>) attributes {dimension_semantics = [#tpu.dimension_semantics<arbitrary>], iteration_bounds = array<i64: 2>, scalar_prefetch = 0 : i64, scratch_operands = 1 : i64, tpu.core_type = #tpu.core_type<tc>, window_params = [{transform_indices = @transform_0, window_bounds = array<i64: 8, 128>}, {transform_indices = @transform_1, window_bounds = array<i64: 128, 256>}, {pipeline_mode = #tpu.pipeline_mode<synchronous>, transform_indices = @transform_2, window_bounds = array<i64: 128, 128>}, {pipeline_mode = #tpu.pipeline_mode<synchronous>, transform_indices = @transform_3, window_bounds = array<i64: 1, 128>}, {pipeline_mode = #tpu.pipeline_mode<synchronous>, transform_indices = @transform_4, window_bounds = array<i64: 1, 128>}, {pipeline_mode = #tpu.pipeline_mode<synchronous>, transform_indices = @transform_5, window_bounds = array<i64: 1, 128>}, {pipeline_mode = #tpu.pipeline_mode<synchronous>, transform_indices = @transform_6, window_bounds = array<i64: 1, 128>}, {pipeline_mode = #tpu.pipeline_mode<synchronous>, transform_indices = @transform_7, window_bounds = array<i64: 1, 128>}, {pipeline_mode = #tpu.pipeline_mode<synchronous>, transform_indices = @transform_8, window_bounds = array<i64: 128, 256>}, {pipeline_mode = #tpu.pipeline_mode<synchronous>, transform_indices = @transform_9, window_bounds = array<i64: 1, 256>}, {pipeline_mode = #tpu.pipeline_mode<synchronous>, transform_indices = @transform_10, window_bounds = array<i64: 8, 128>}, {pipeline_mode = #tpu.pipeline_mode<synchronous>, transform_indices = @transform_11, window_bounds = array<i64: 8, 384>}]} {
    %c0_i32 = arith.constant 0 : i32
    %0 = arith.cmpi eq, %arg0, %c0_i32 : i32
    %1 = arith.extui %0 : i1 to i32
    %c0_i32_0 = arith.constant 0 : i32
    %2 = arith.cmpi ne, %1, %c0_i32_0 : i32
    scf.if %2 {
      %cst_9 = arith.constant 0.000000e+00 : f32
      %13 = vector.broadcast %cst_9 : f32 to vector<8x256xf32>
      %c0_10 = arith.constant 0 : index
      %c0_11 = arith.constant 0 : index
      %14 = vector.load %arg13[%c0_10, %c0_11] : memref<8x256xf32, #tpu.memory_space<vmem>>, vector<8x256xf32>
      tpu.vector_store %arg13[%c0_10, %c0_11], %13 {strides = array<i32>} : memref<8x256xf32, #tpu.memory_space<vmem>>, vector<8x256xf32>,
    } else {
    }
    %c0 = arith.constant 0 : index
    %c0_1 = arith.constant 0 : index
    %3 = vector.load %arg13[%c0, %c0_1] : memref<8x256xf32, #tpu.memory_space<vmem>>, vector<8x256xf32>
    %c0_2 = arith.constant 0 : index
    %c0_3 = arith.constant 0 : index
    %4 = vector.load %arg1[%c0_2, %c0_3] : memref<8x128xf32, #tpu.memory_space<vmem>>, vector<8x128xf32>
    %5 = arith.truncf %4 : vector<8x128xf32> to vector<8x128xbf16>
    %c0_4 = arith.constant 0 : index
    %c0_5 = arith.constant 0 : index
    %6 = vector.load %arg2[%c0_4, %c0_5] : memref<128x256xbf16, #tpu.memory_space<vmem>>, vector<128x256xbf16>
    %cst = arith.constant dense<0.000000e+00> : vector<8x256xf32>
    %7 = tpu.matmul %5, %6, %cst {dimension_numbers = #tpu.dot_dimension_numbers<[1], [0], [0], [1], [0, 0, 1, 1], [], []>} : vector<8x128xbf16>, vector<128x256xbf16>, vector<8x256xf32> -> vector<8x256xf32>
    %8 = arith.addf %3, %7 : vector<8x256xf32>
    %c0_6 = arith.constant 0 : index
    %c0_7 = arith.constant 0 : index
    %9 = vector.load %arg13[%c0_6, %c0_7] : memref<8x256xf32, #tpu.memory_space<vmem>>, vector<8x256xf32>
    tpu.vector_store %arg13[%c0_6, %c0_7], %8 {strides = array<i32>} : memref<8x256xf32, #tpu.memory_space<vmem>>, vector<8x256xf32>,
    %c1_i32 = arith.constant 1 : i32
    %10 = arith.cmpi eq, %arg0, %c1_i32 : i32
    %11 = arith.extui %10 : i1 to i32
    %c0_i32_8 = arith.constant 0 : i32
    %12 = arith.cmpi ne, %11, %c0_i32_8 : i32
    scf.if %12 {
      %c0_9 = arith.constant 0 : index
      %c0_10 = arith.constant 0 : index
      %13 = vector.load %arg13[%c0_9, %c0_10] : memref<8x256xf32, #tpu.memory_space<vmem>>, vector<8x256xf32>
      %14 = vector.extract_strided_slice %13 {offsets = [0, 0], sizes = [8, 128], strides = [1, 1]} : vector<8x256xf32> to vector<8x128xf32>
      %c0_11 = arith.constant 0 : index
      %c0_12 = arith.constant 0 : index
      %15 = vector.load %arg4[%c0_11, %c0_12] : memref<1x128xf32, #tpu.memory_space<vmem>>, vector<1x128xf32>
      %16 = vector.broadcast %15 : vector<1x128xf32> to vector<8x128xf32>
      %17 = arith.mulf %14, %16 : vector<8x128xf32>
      %c0_13 = arith.constant 0 : index
      %c0_14 = arith.constant 0 : index
      %18 = vector.load %arg5[%c0_13, %c0_14] : memref<1x128xf32, #tpu.memory_space<vmem>>, vector<1x128xf32>
      %19 = vector.broadcast %18 : vector<1x128xf32> to vector<8x128xf32>
      %20 = arith.addf %17, %19 : vector<8x128xf32>
      %cst_15 = arith.constant 0.000000e+00 : f32
      %21 = vector.broadcast %cst_15 : f32 to vector<8x128xf32>
      %22 = arith.cmpf oge, %20, %21 : vector<8x128xf32>
      %cst_16 = arith.constant 2.000000e-01 : f32
      %23 = vector.broadcast %cst_16 : f32 to vector<8x128xf32>
      %24 = arith.mulf %23, %20 : vector<8x128xf32>
      %25 = arith.select %22, %20, %24 : vector<8x128xi1>, vector<8x128xf32>
      %26 = vector.extract_strided_slice %13 {offsets = [0, 128], sizes = [8, 128], strides = [1, 1]} : vector<8x256xf32> to vector<8x128xf32>
      %c0_17 = arith.constant 0 : index
      %c0_18 = arith.constant 0 : index
      %27 = vector.load %arg8[%c0_17, %c0_18] : memref<1x128xf32, #tpu.memory_space<vmem>>, vector<1x128xf32>
      %28 = vector.broadcast %27 : vector<1x128xf32> to vector<8x128xf32>
      %29 = arith.addf %26, %28 : vector<8x128xf32>
      %cst_19 = arith.constant 0.000000e+00 : f32
      %30 = vector.broadcast %cst_19 : f32 to vector<8x128xf32>
      %31 = arith.cmpf oge, %29, %30 : vector<8x128xf32>
      %cst_20 = arith.constant 2.000000e-01 : f32
      %32 = vector.broadcast %cst_20 : f32 to vector<8x128xf32>
      %33 = arith.mulf %32, %29 : vector<8x128xf32>
      %34 = arith.select %31, %29, %33 : vector<8x128xi1>, vector<8x128xf32>
      %35 = arith.truncf %25 : vector<8x128xf32> to vector<8x128xbf16>
      %c0_21 = arith.constant 0 : index
      %c0_22 = arith.constant 0 : index
      %36 = vector.load %arg3[%c0_21, %c0_22] : memref<128x128xbf16, #tpu.memory_space<vmem>>, vector<128x128xbf16>
      %cst_23 = arith.constant dense<0.000000e+00> : vector<8x128xf32>
      %37 = tpu.matmul %35, %36, %cst_23 {dimension_numbers = #tpu.dot_dimension_numbers<[1], [0], [0], [1], [0, 0, 1, 1], [], []>} : vector<8x128xbf16>, vector<128x128xbf16>, vector<8x128xf32> -> vector<8x128xf32>
      %c0_24 = arith.constant 0 : index
      %c0_25 = arith.constant 0 : index
      %38 = vector.load %arg6[%c0_24, %c0_25] : memref<1x128xf32, #tpu.memory_space<vmem>>, vector<1x128xf32>
      %39 = vector.broadcast %38 : vector<1x128xf32> to vector<8x128xf32>
      %40 = arith.mulf %37, %39 : vector<8x128xf32>
      %c0_26 = arith.constant 0 : index
      %c0_27 = arith.constant 0 : index
      %41 = vector.load %arg7[%c0_26, %c0_27] : memref<1x128xf32, #tpu.memory_space<vmem>>, vector<1x128xf32>
      %42 = vector.broadcast %41 : vector<1x128xf32> to vector<8x128xf32>
      %43 = arith.addf %40, %42 : vector<8x128xf32>
      %44 = arith.addf %43, %34 : vector<8x128xf32>
      %cst_28 = arith.constant 0.000000e+00 : f32
      %45 = vector.broadcast %cst_28 : f32 to vector<8x128xf32>
      %46 = arith.cmpf oge, %44, %45 : vector<8x128xf32>
      %cst_29 = arith.constant 2.000000e-01 : f32
      %47 = vector.broadcast %cst_29 : f32 to vector<8x128xf32>
      %48 = arith.mulf %47, %44 : vector<8x128xf32>
      %49 = arith.select %46, %44, %48 : vector<8x128xi1>, vector<8x128xf32>
      %50 = arith.truncf %49 : vector<8x128xf32> to vector<8x128xbf16>
      %c0_30 = arith.constant 0 : index
      %c0_31 = arith.constant 0 : index
      %51 = vector.load %arg9[%c0_30, %c0_31] : memref<128x256xbf16, #tpu.memory_space<vmem>>, vector<128x256xbf16>
      %cst_32 = arith.constant dense<0.000000e+00> : vector<8x256xf32>
      %52 = tpu.matmul %50, %51, %cst_32 {dimension_numbers = #tpu.dot_dimension_numbers<[1], [0], [0], [1], [0, 0, 1, 1], [], []>} : vector<8x128xbf16>, vector<128x256xbf16>, vector<8x256xf32> -> vector<8x256xf32>
      %c0_33 = arith.constant 0 : index
      %c0_34 = arith.constant 0 : index
      %53 = vector.load %arg10[%c0_33, %c0_34] : memref<1x256xf32, #tpu.memory_space<vmem>>, vector<1x256xf32>
      %54 = vector.broadcast %53 : vector<1x256xf32> to vector<8x256xf32>
      %55 = arith.addf %52, %54 : vector<8x256xf32>
      %56 = vector.extract_strided_slice %55 {offsets = [0, 0], sizes = [8, 128], strides = [1, 1]} : vector<8x256xf32> to vector<8x128xf32>
      %57 = vector.extract_strided_slice %55 {offsets = [0, 128], sizes = [8, 128], strides = [1, 1]} : vector<8x256xf32> to vector<8x128xf32>
      %cst_35 = arith.constant 5.000000e-01 : f32
      %58 = vector.broadcast %cst_35 : f32 to vector<8x128xf32>
      %59 = arith.mulf %58, %57 : vector<8x128xf32>
      %60 = math.exp %59 : vector<8x128xf32>
      %c0_36 = arith.constant 0 : index
      %c0_37 = arith.constant 0 : index
      %61 = vector.load %arg11[%c0_36, %c0_37] : memref<8x128xf32, #tpu.memory_space<vmem>>, vector<8x128xf32>
      %62 = arith.mulf %60, %61 : vector<8x128xf32>
      %63 = arith.addf %56, %62 : vector<8x128xf32>
      %64 = tpu.concatenate %56, %57, %63 in 1 : vector<8x128xf32>, vector<8x128xf32>, vector<8x128xf32> -> vector<8x384xf32>
      %c0_38 = arith.constant 0 : index
      %c0_39 = arith.constant 0 : index
      %65 = vector.load %arg12[%c0_38, %c0_39] : memref<8x384xf32, #tpu.memory_space<vmem>>, vector<8x384xf32>
      tpu.vector_store %arg12[%c0_38, %c0_39], %64 {strides = array<i32>} : memref<8x384xf32, #tpu.memory_space<vmem>>, vector<8x384xf32>,
    } else {
    }
    return
  }
  func.func @transform_0(%arg0: i32) -> (i32, i32) {
    %c0_i32 = arith.constant 0 : i32
    %c0_i32_0 = arith.constant 0 : i32
    return %c0_i32, %arg0 : i32, i32
  }
  func.func @transform_1(%arg0: i32) -> (i32, i32) {
    %c0_i32 = arith.constant 0 : i32
    %c0_i32_0 = arith.constant 0 : i32
    return %arg0, %c0_i32 : i32, i32
  }
  func.func @transform_2(%arg0: i32) -> (i32, i32) {
    %c0_i32 = arith.constant 0 : i32
    %c0_i32_0 = arith.constant 0 : i32
    %c0_i32_1 = arith.constant 0 : i32
    return %c0_i32, %c0_i32_0 : i32, i32
  }
  func.func @transform_3(%arg0: i32) -> (i32, i32) {
    %c0_i32 = arith.constant 0 : i32
    %c0_i32_0 = arith.constant 0 : i32
    %c0_i32_1 = arith.constant 0 : i32
    return %c0_i32, %c0_i32_0 : i32, i32
  }
  func.func @transform_4(%arg0: i32) -> (i32, i32) {
    %c0_i32 = arith.constant 0 : i32
    %c0_i32_0 = arith.constant 0 : i32
    %c0_i32_1 = arith.constant 0 : i32
    return %c0_i32, %c0_i32_0 : i32, i32
  }
  func.func @transform_5(%arg0: i32) -> (i32, i32) {
    %c0_i32 = arith.constant 0 : i32
    %c0_i32_0 = arith.constant 0 : i32
    %c0_i32_1 = arith.constant 0 : i32
    return %c0_i32, %c0_i32_0 : i32, i32
  }
  func.func @transform_6(%arg0: i32) -> (i32, i32) {
    %c0_i32 = arith.constant 0 : i32
    %c0_i32_0 = arith.constant 0 : i32
    %c0_i32_1 = arith.constant 0 : i32
    return %c0_i32, %c0_i32_0 : i32, i32
  }
  func.func @transform_7(%arg0: i32) -> (i32, i32) {
    %c0_i32 = arith.constant 0 : i32
    %c0_i32_0 = arith.constant 0 : i32
    %c0_i32_1 = arith.constant 0 : i32
    return %c0_i32, %c0_i32_0 : i32, i32
  }
  func.func @transform_8(%arg0: i32) -> (i32, i32) {
    %c0_i32 = arith.constant 0 : i32
    %c0_i32_0 = arith.constant 0 : i32
    %c0_i32_1 = arith.constant 0 : i32
    return %c0_i32, %c0_i32_0 : i32, i32
  }
  func.func @transform_9(%arg0: i32) -> (i32, i32) {
    %c0_i32 = arith.constant 0 : i32
    %c0_i32_0 = arith.constant 0 : i32
    %c0_i32_1 = arith.constant 0 : i32
    return %c0_i32, %c0_i32_0 : i32, i32
  }
  func.func @transform_10(%arg0: i32) -> (i32, i32) {
    %c0_i32 = arith.constant 0 : i32
    %c0_i32_0 = arith.constant 0 : i32
    %c0_i32_1 = arith.constant 0 : i32
    return %c0_i32, %c0_i32_0 : i32, i32
  }
  func.func @transform_11(%arg0: i32) -> (i32, i32) {
    %c0_i32 = arith.constant 0 : i32
    %c0_i32_0 = arith.constant 0 : i32
    %c0_i32_1 = arith.constant 0 : i32
    return %c0_i32, %c0_i32_0 : i32, i32
  }
}

module attributes {stable_mosaic.version = 11 : i64} {
  func.func @kernel(%arg0: i32, %arg1: memref<8x128xf32, #tpu.memory_space<vmem>>, %arg2: memref<128x256xbf16, #tpu.memory_space<vmem>>, %arg3: memref<128x128xbf16, #tpu.memory_space<vmem>>, %arg4: memref<1x128xf32, #tpu.memory_space<vmem>>, %arg5: memref<1x128xf32, #tpu.memory_space<vmem>>, %arg6: memref<1x128xf32, #tpu.memory_space<vmem>>, %arg7: memref<1x128xf32, #tpu.memory_space<vmem>>, %arg8: memref<1x128xf32, #tpu.memory_space<vmem>>, %arg9: memref<8x128xf32, #tpu.memory_space<vmem>>, %arg10: memref<8x256xf32, #tpu.memory_space<vmem>>) attributes {dimension_semantics = [#tpu.dimension_semantics<arbitrary>], iteration_bounds = array<i64: 1>, scalar_prefetch = 0 : i64, scratch_operands = 1 : i64, tpu.core_type = #tpu.core_type<tc>, window_params = [{transform_indices = @transform_0, window_bounds = array<i64: 8, 128>}, {transform_indices = @transform_1, window_bounds = array<i64: 128, 256>}, {pipeline_mode = #tpu.pipeline_mode<synchronous>, transform_indices = @transform_2, window_bounds = array<i64: 128, 128>}, {pipeline_mode = #tpu.pipeline_mode<synchronous>, transform_indices = @transform_3, window_bounds = array<i64: 1, 128>}, {pipeline_mode = #tpu.pipeline_mode<synchronous>, transform_indices = @transform_4, window_bounds = array<i64: 1, 128>}, {pipeline_mode = #tpu.pipeline_mode<synchronous>, transform_indices = @transform_5, window_bounds = array<i64: 1, 128>}, {pipeline_mode = #tpu.pipeline_mode<synchronous>, transform_indices = @transform_6, window_bounds = array<i64: 1, 128>}, {pipeline_mode = #tpu.pipeline_mode<synchronous>, transform_indices = @transform_7, window_bounds = array<i64: 1, 128>}, {pipeline_mode = #tpu.pipeline_mode<synchronous>, transform_indices = @transform_8, window_bounds = array<i64: 8, 128>}]} {
    %c0_i32 = arith.constant 0 : i32
    %0 = arith.cmpi eq, %arg0, %c0_i32 : i32
    %1 = arith.extui %0 : i1 to i32
    %c0_i32_0 = arith.constant 0 : i32
    %2 = arith.cmpi ne, %1, %c0_i32_0 : i32
    scf.if %2 {
      %cst_10 = arith.constant 0.000000e+00 : f32
      %13 = vector.broadcast %cst_10 : f32 to vector<8x256xf32>
      %c0_11 = arith.constant 0 : index
      %c0_12 = arith.constant 0 : index
      %14 = vector.load %arg10[%c0_11, %c0_12] : memref<8x256xf32, #tpu.memory_space<vmem>>, vector<8x256xf32>
      tpu.vector_store %arg10[%c0_11, %c0_12], %13 {strides = array<i32>} : memref<8x256xf32, #tpu.memory_space<vmem>>, vector<8x256xf32>,
    } else {
    }
    %c0 = arith.constant 0 : index
    %c0_1 = arith.constant 0 : index
    %3 = vector.load %arg10[%c0, %c0_1] : memref<8x256xf32, #tpu.memory_space<vmem>>, vector<8x256xf32>
    %c0_2 = arith.constant 0 : index
    %c0_3 = arith.constant 0 : index
    %4 = vector.load %arg1[%c0_2, %c0_3] : memref<8x128xf32, #tpu.memory_space<vmem>>, vector<8x128xf32>
    %5 = arith.truncf %4 : vector<8x128xf32> to vector<8x128xbf16>
    %c0_4 = arith.constant 0 : index
    %c0_5 = arith.constant 0 : index
    %6 = vector.load %arg2[%c0_4, %c0_5] : memref<128x256xbf16, #tpu.memory_space<vmem>>, vector<128x256xbf16>
    %cst = arith.constant dense<0.000000e+00> : vector<8x256xf32>
    %7 = tpu.matmul %5, %6, %cst {dimension_numbers = #tpu.dot_dimension_numbers<[1], [0], [0], [1], [0, 0, 1, 1], [], []>} : vector<8x128xbf16>, vector<128x256xbf16>, vector<8x256xf32> -> vector<8x256xf32>
    %8 = arith.addf %3, %7 : vector<8x256xf32>
    %c0_6 = arith.constant 0 : index
    %c0_7 = arith.constant 0 : index
    %9 = vector.load %arg10[%c0_6, %c0_7] : memref<8x256xf32, #tpu.memory_space<vmem>>, vector<8x256xf32>
    tpu.vector_store %arg10[%c0_6, %c0_7], %8 {strides = array<i32>} : memref<8x256xf32, #tpu.memory_space<vmem>>, vector<8x256xf32>,
    %c0_i32_8 = arith.constant 0 : i32
    %10 = arith.cmpi eq, %arg0, %c0_i32_8 : i32
    %11 = arith.extui %10 : i1 to i32
    %c0_i32_9 = arith.constant 0 : i32
    %12 = arith.cmpi ne, %11, %c0_i32_9 : i32
    scf.if %12 {
      %c0_10 = arith.constant 0 : index
      %c0_11 = arith.constant 0 : index
      %13 = vector.load %arg10[%c0_10, %c0_11] : memref<8x256xf32, #tpu.memory_space<vmem>>, vector<8x256xf32>
      %14 = vector.extract_strided_slice %13 {offsets = [0, 0], sizes = [8, 128], strides = [1, 1]} : vector<8x256xf32> to vector<8x128xf32>
      %c0_12 = arith.constant 0 : index
      %c0_13 = arith.constant 0 : index
      %15 = vector.load %arg4[%c0_12, %c0_13] : memref<1x128xf32, #tpu.memory_space<vmem>>, vector<1x128xf32>
      %16 = vector.broadcast %15 : vector<1x128xf32> to vector<8x128xf32>
      %17 = arith.mulf %14, %16 : vector<8x128xf32>
      %c0_14 = arith.constant 0 : index
      %c0_15 = arith.constant 0 : index
      %18 = vector.load %arg5[%c0_14, %c0_15] : memref<1x128xf32, #tpu.memory_space<vmem>>, vector<1x128xf32>
      %19 = vector.broadcast %18 : vector<1x128xf32> to vector<8x128xf32>
      %20 = arith.addf %17, %19 : vector<8x128xf32>
      %cst_16 = arith.constant 0.000000e+00 : f32
      %21 = vector.broadcast %cst_16 : f32 to vector<8x128xf32>
      %22 = arith.cmpf oge, %20, %21 : vector<8x128xf32>
      %cst_17 = arith.constant 2.000000e-01 : f32
      %23 = vector.broadcast %cst_17 : f32 to vector<8x128xf32>
      %24 = arith.mulf %23, %20 : vector<8x128xf32>
      %25 = arith.select %22, %20, %24 : vector<8x128xi1>, vector<8x128xf32>
      %26 = vector.extract_strided_slice %13 {offsets = [0, 128], sizes = [8, 128], strides = [1, 1]} : vector<8x256xf32> to vector<8x128xf32>
      %c0_18 = arith.constant 0 : index
      %c0_19 = arith.constant 0 : index
      %27 = vector.load %arg8[%c0_18, %c0_19] : memref<1x128xf32, #tpu.memory_space<vmem>>, vector<1x128xf32>
      %28 = vector.broadcast %27 : vector<1x128xf32> to vector<8x128xf32>
      %29 = arith.addf %26, %28 : vector<8x128xf32>
      %cst_20 = arith.constant 0.000000e+00 : f32
      %30 = vector.broadcast %cst_20 : f32 to vector<8x128xf32>
      %31 = arith.cmpf oge, %29, %30 : vector<8x128xf32>
      %cst_21 = arith.constant 2.000000e-01 : f32
      %32 = vector.broadcast %cst_21 : f32 to vector<8x128xf32>
      %33 = arith.mulf %32, %29 : vector<8x128xf32>
      %34 = arith.select %31, %29, %33 : vector<8x128xi1>, vector<8x128xf32>
      %35 = arith.truncf %25 : vector<8x128xf32> to vector<8x128xbf16>
      %c0_22 = arith.constant 0 : index
      %c0_23 = arith.constant 0 : index
      %36 = vector.load %arg3[%c0_22, %c0_23] : memref<128x128xbf16, #tpu.memory_space<vmem>>, vector<128x128xbf16>
      %cst_24 = arith.constant dense<0.000000e+00> : vector<8x128xf32>
      %37 = tpu.matmul %35, %36, %cst_24 {dimension_numbers = #tpu.dot_dimension_numbers<[1], [0], [0], [1], [0, 0, 1, 1], [], []>} : vector<8x128xbf16>, vector<128x128xbf16>, vector<8x128xf32> -> vector<8x128xf32>
      %c0_25 = arith.constant 0 : index
      %c0_26 = arith.constant 0 : index
      %38 = vector.load %arg6[%c0_25, %c0_26] : memref<1x128xf32, #tpu.memory_space<vmem>>, vector<1x128xf32>
      %39 = vector.broadcast %38 : vector<1x128xf32> to vector<8x128xf32>
      %40 = arith.mulf %37, %39 : vector<8x128xf32>
      %c0_27 = arith.constant 0 : index
      %c0_28 = arith.constant 0 : index
      %41 = vector.load %arg7[%c0_27, %c0_28] : memref<1x128xf32, #tpu.memory_space<vmem>>, vector<1x128xf32>
      %42 = vector.broadcast %41 : vector<1x128xf32> to vector<8x128xf32>
      %43 = arith.addf %40, %42 : vector<8x128xf32>
      %44 = arith.addf %43, %34 : vector<8x128xf32>
      %cst_29 = arith.constant 0.000000e+00 : f32
      %45 = vector.broadcast %cst_29 : f32 to vector<8x128xf32>
      %46 = arith.cmpf oge, %44, %45 : vector<8x128xf32>
      %cst_30 = arith.constant 2.000000e-01 : f32
      %47 = vector.broadcast %cst_30 : f32 to vector<8x128xf32>
      %48 = arith.mulf %47, %44 : vector<8x128xf32>
      %49 = arith.select %46, %44, %48 : vector<8x128xi1>, vector<8x128xf32>
      %c0_31 = arith.constant 0 : index
      %c0_32 = arith.constant 0 : index
      %50 = vector.load %arg9[%c0_31, %c0_32] : memref<8x128xf32, #tpu.memory_space<vmem>>, vector<8x128xf32>
      tpu.vector_store %arg9[%c0_31, %c0_32], %49 {strides = array<i32>} : memref<8x128xf32, #tpu.memory_space<vmem>>, vector<8x128xf32>,
    } else {
    }
    return
  }
  func.func @transform_0(%arg0: i32) -> (i32, i32) {
    %c0_i32 = arith.constant 0 : i32
    %c0_i32_0 = arith.constant 0 : i32
    return %c0_i32, %arg0 : i32, i32
  }
  func.func @transform_1(%arg0: i32) -> (i32, i32) {
    %c0_i32 = arith.constant 0 : i32
    %c0_i32_0 = arith.constant 0 : i32
    return %arg0, %c0_i32 : i32, i32
  }
  func.func @transform_2(%arg0: i32) -> (i32, i32) {
    %c0_i32 = arith.constant 0 : i32
    %c0_i32_0 = arith.constant 0 : i32
    %c0_i32_1 = arith.constant 0 : i32
    return %c0_i32, %c0_i32_0 : i32, i32
  }
  func.func @transform_3(%arg0: i32) -> (i32, i32) {
    %c0_i32 = arith.constant 0 : i32
    %c0_i32_0 = arith.constant 0 : i32
    %c0_i32_1 = arith.constant 0 : i32
    return %c0_i32, %c0_i32_0 : i32, i32
  }
  func.func @transform_4(%arg0: i32) -> (i32, i32) {
    %c0_i32 = arith.constant 0 : i32
    %c0_i32_0 = arith.constant 0 : i32
    %c0_i32_1 = arith.constant 0 : i32
    return %c0_i32, %c0_i32_0 : i32, i32
  }
  func.func @transform_5(%arg0: i32) -> (i32, i32) {
    %c0_i32 = arith.constant 0 : i32
    %c0_i32_0 = arith.constant 0 : i32
    %c0_i32_1 = arith.constant 0 : i32
    return %c0_i32, %c0_i32_0 : i32, i32
  }
  func.func @transform_6(%arg0: i32) -> (i32, i32) {
    %c0_i32 = arith.constant 0 : i32
    %c0_i32_0 = arith.constant 0 : i32
    %c0_i32_1 = arith.constant 0 : i32
    return %c0_i32, %c0_i32_0 : i32, i32
  }
  func.func @transform_7(%arg0: i32) -> (i32, i32) {
    %c0_i32 = arith.constant 0 : i32
    %c0_i32_0 = arith.constant 0 : i32
    %c0_i32_1 = arith.constant 0 : i32
    return %c0_i32, %c0_i32_0 : i32, i32
  }
  func.func @transform_8(%arg0: i32) -> (i32, i32) {
    %c0_i32 = arith.constant 0 : i32
    %c0_i32_0 = arith.constant 0 : i32
    %c0_i32_1 = arith.constant 0 : i32
    return %c0_i32, %c0_i32_0 : i32, i32
  }
}

module attributes {stable_mosaic.version = 11 : i64} {
  func.func @kernel(%arg0: i32, %arg1: memref<8x128xf32, #tpu.memory_space<vmem>>, %arg2: memref<128x256xbf16, #tpu.memory_space<vmem>>, %arg3: memref<128x128xbf16, #tpu.memory_space<vmem>>, %arg4: memref<1x128xf32, #tpu.memory_space<vmem>>, %arg5: memref<1x128xf32, #tpu.memory_space<vmem>>, %arg6: memref<1x128xf32, #tpu.memory_space<vmem>>, %arg7: memref<1x128xf32, #tpu.memory_space<vmem>>, %arg8: memref<1x128xf32, #tpu.memory_space<vmem>>, %arg9: memref<8x128xf32, #tpu.memory_space<vmem>>, %arg10: memref<8x256xf32, #tpu.memory_space<vmem>>) attributes {dimension_semantics = [#tpu.dimension_semantics<arbitrary>], iteration_bounds = array<i64: 1>, scalar_prefetch = 0 : i64, scratch_operands = 1 : i64, tpu.core_type = #tpu.core_type<tc>, window_params = [{transform_indices = @transform_0, window_bounds = array<i64: 8, 128>}, {transform_indices = @transform_1, window_bounds = array<i64: 128, 256>}, {pipeline_mode = #tpu.pipeline_mode<synchronous>, transform_indices = @transform_2, window_bounds = array<i64: 128, 128>}, {pipeline_mode = #tpu.pipeline_mode<synchronous>, transform_indices = @transform_3, window_bounds = array<i64: 1, 128>}, {pipeline_mode = #tpu.pipeline_mode<synchronous>, transform_indices = @transform_4, window_bounds = array<i64: 1, 128>}, {pipeline_mode = #tpu.pipeline_mode<synchronous>, transform_indices = @transform_5, window_bounds = array<i64: 1, 128>}, {pipeline_mode = #tpu.pipeline_mode<synchronous>, transform_indices = @transform_6, window_bounds = array<i64: 1, 128>}, {pipeline_mode = #tpu.pipeline_mode<synchronous>, transform_indices = @transform_7, window_bounds = array<i64: 1, 128>}, {pipeline_mode = #tpu.pipeline_mode<synchronous>, transform_indices = @transform_8, window_bounds = array<i64: 8, 128>}]} {
    %c0_i32 = arith.constant 0 : i32
    %0 = arith.cmpi eq, %arg0, %c0_i32 : i32
    %1 = arith.extui %0 : i1 to i32
    %c0_i32_0 = arith.constant 0 : i32
    %2 = arith.cmpi ne, %1, %c0_i32_0 : i32
    scf.if %2 {
      %cst_10 = arith.constant 0.000000e+00 : f32
      %13 = vector.broadcast %cst_10 : f32 to vector<8x256xf32>
      %c0_11 = arith.constant 0 : index
      %c0_12 = arith.constant 0 : index
      %14 = vector.load %arg10[%c0_11, %c0_12] : memref<8x256xf32, #tpu.memory_space<vmem>>, vector<8x256xf32>
      tpu.vector_store %arg10[%c0_11, %c0_12], %13 {strides = array<i32>} : memref<8x256xf32, #tpu.memory_space<vmem>>, vector<8x256xf32>,
    } else {
    }
    %c0 = arith.constant 0 : index
    %c0_1 = arith.constant 0 : index
    %3 = vector.load %arg10[%c0, %c0_1] : memref<8x256xf32, #tpu.memory_space<vmem>>, vector<8x256xf32>
    %c0_2 = arith.constant 0 : index
    %c0_3 = arith.constant 0 : index
    %4 = vector.load %arg1[%c0_2, %c0_3] : memref<8x128xf32, #tpu.memory_space<vmem>>, vector<8x128xf32>
    %5 = arith.truncf %4 : vector<8x128xf32> to vector<8x128xbf16>
    %c0_4 = arith.constant 0 : index
    %c0_5 = arith.constant 0 : index
    %6 = vector.load %arg2[%c0_4, %c0_5] : memref<128x256xbf16, #tpu.memory_space<vmem>>, vector<128x256xbf16>
    %cst = arith.constant dense<0.000000e+00> : vector<8x256xf32>
    %7 = tpu.matmul %5, %6, %cst {dimension_numbers = #tpu.dot_dimension_numbers<[1], [0], [0], [1], [0, 0, 1, 1], [], []>} : vector<8x128xbf16>, vector<128x256xbf16>, vector<8x256xf32> -> vector<8x256xf32>
    %8 = arith.addf %3, %7 : vector<8x256xf32>
    %c0_6 = arith.constant 0 : index
    %c0_7 = arith.constant 0 : index
    %9 = vector.load %arg10[%c0_6, %c0_7] : memref<8x256xf32, #tpu.memory_space<vmem>>, vector<8x256xf32>
    tpu.vector_store %arg10[%c0_6, %c0_7], %8 {strides = array<i32>} : memref<8x256xf32, #tpu.memory_space<vmem>>, vector<8x256xf32>,
    %c0_i32_8 = arith.constant 0 : i32
    %10 = arith.cmpi eq, %arg0, %c0_i32_8 : i32
    %11 = arith.extui %10 : i1 to i32
    %c0_i32_9 = arith.constant 0 : i32
    %12 = arith.cmpi ne, %11, %c0_i32_9 : i32
    scf.if %12 {
      %c0_10 = arith.constant 0 : index
      %c0_11 = arith.constant 0 : index
      %13 = vector.load %arg10[%c0_10, %c0_11] : memref<8x256xf32, #tpu.memory_space<vmem>>, vector<8x256xf32>
      %14 = vector.extract_strided_slice %13 {offsets = [0, 0], sizes = [8, 128], strides = [1, 1]} : vector<8x256xf32> to vector<8x128xf32>
      %c0_12 = arith.constant 0 : index
      %c0_13 = arith.constant 0 : index
      %15 = vector.load %arg4[%c0_12, %c0_13] : memref<1x128xf32, #tpu.memory_space<vmem>>, vector<1x128xf32>
      %16 = vector.broadcast %15 : vector<1x128xf32> to vector<8x128xf32>
      %17 = arith.mulf %14, %16 : vector<8x128xf32>
      %c0_14 = arith.constant 0 : index
      %c0_15 = arith.constant 0 : index
      %18 = vector.load %arg5[%c0_14, %c0_15] : memref<1x128xf32, #tpu.memory_space<vmem>>, vector<1x128xf32>
      %19 = vector.broadcast %18 : vector<1x128xf32> to vector<8x128xf32>
      %20 = arith.addf %17, %19 : vector<8x128xf32>
      %cst_16 = arith.constant 0.000000e+00 : f32
      %21 = vector.broadcast %cst_16 : f32 to vector<8x128xf32>
      %22 = arith.cmpf oge, %20, %21 : vector<8x128xf32>
      %cst_17 = arith.constant 2.000000e-01 : f32
      %23 = vector.broadcast %cst_17 : f32 to vector<8x128xf32>
      %24 = arith.mulf %23, %20 : vector<8x128xf32>
      %25 = arith.select %22, %20, %24 : vector<8x128xi1>, vector<8x128xf32>
      %26 = vector.extract_strided_slice %13 {offsets = [0, 128], sizes = [8, 128], strides = [1, 1]} : vector<8x256xf32> to vector<8x128xf32>
      %c0_18 = arith.constant 0 : index
      %c0_19 = arith.constant 0 : index
      %27 = vector.load %arg8[%c0_18, %c0_19] : memref<1x128xf32, #tpu.memory_space<vmem>>, vector<1x128xf32>
      %28 = vector.broadcast %27 : vector<1x128xf32> to vector<8x128xf32>
      %29 = arith.addf %26, %28 : vector<8x128xf32>
      %cst_20 = arith.constant 0.000000e+00 : f32
      %30 = vector.broadcast %cst_20 : f32 to vector<8x128xf32>
      %31 = arith.cmpf oge, %29, %30 : vector<8x128xf32>
      %cst_21 = arith.constant 2.000000e-01 : f32
      %32 = vector.broadcast %cst_21 : f32 to vector<8x128xf32>
      %33 = arith.mulf %32, %29 : vector<8x128xf32>
      %34 = arith.select %31, %29, %33 : vector<8x128xi1>, vector<8x128xf32>
      %35 = arith.truncf %25 : vector<8x128xf32> to vector<8x128xbf16>
      %c0_22 = arith.constant 0 : index
      %c0_23 = arith.constant 0 : index
      %36 = vector.load %arg3[%c0_22, %c0_23] : memref<128x128xbf16, #tpu.memory_space<vmem>>, vector<128x128xbf16>
      %cst_24 = arith.constant dense<0.000000e+00> : vector<8x128xf32>
      %37 = tpu.matmul %35, %36, %cst_24 {dimension_numbers = #tpu.dot_dimension_numbers<[1], [0], [0], [1], [0, 0, 1, 1], [], []>} : vector<8x128xbf16>, vector<128x128xbf16>, vector<8x128xf32> -> vector<8x128xf32>
      %c0_25 = arith.constant 0 : index
      %c0_26 = arith.constant 0 : index
      %38 = vector.load %arg6[%c0_25, %c0_26] : memref<1x128xf32, #tpu.memory_space<vmem>>, vector<1x128xf32>
      %39 = vector.broadcast %38 : vector<1x128xf32> to vector<8x128xf32>
      %40 = arith.mulf %37, %39 : vector<8x128xf32>
      %c0_27 = arith.constant 0 : index
      %c0_28 = arith.constant 0 : index
      %41 = vector.load %arg7[%c0_27, %c0_28] : memref<1x128xf32, #tpu.memory_space<vmem>>, vector<1x128xf32>
      %42 = vector.broadcast %41 : vector<1x128xf32> to vector<8x128xf32>
      %43 = arith.addf %40, %42 : vector<8x128xf32>
      %44 = arith.addf %43, %34 : vector<8x128xf32>
      %cst_29 = arith.constant 0.000000e+00 : f32
      %45 = vector.broadcast %cst_29 : f32 to vector<8x128xf32>
      %46 = arith.cmpf oge, %44, %45 : vector<8x128xf32>
      %cst_30 = arith.constant 2.000000e-01 : f32
      %47 = vector.broadcast %cst_30 : f32 to vector<8x128xf32>
      %48 = arith.mulf %47, %44 : vector<8x128xf32>
      %49 = arith.select %46, %44, %48 : vector<8x128xi1>, vector<8x128xf32>
      %c0_31 = arith.constant 0 : index
      %c0_32 = arith.constant 0 : index
      %50 = vector.load %arg9[%c0_31, %c0_32] : memref<8x128xf32, #tpu.memory_space<vmem>>, vector<8x128xf32>
      tpu.vector_store %arg9[%c0_31, %c0_32], %49 {strides = array<i32>} : memref<8x128xf32, #tpu.memory_space<vmem>>, vector<8x128xf32>,
    } else {
    }
    return
  }
  func.func @transform_0(%arg0: i32) -> (i32, i32) {
    %c0_i32 = arith.constant 0 : i32
    %c0_i32_0 = arith.constant 0 : i32
    return %c0_i32, %arg0 : i32, i32
  }
  func.func @transform_1(%arg0: i32) -> (i32, i32) {
    %c0_i32 = arith.constant 0 : i32
    %c0_i32_0 = arith.constant 0 : i32
    return %arg0, %c0_i32 : i32, i32
  }
  func.func @transform_2(%arg0: i32) -> (i32, i32) {
    %c0_i32 = arith.constant 0 : i32
    %c0_i32_0 = arith.constant 0 : i32
    %c0_i32_1 = arith.constant 0 : i32
    return %c0_i32, %c0_i32_0 : i32, i32
  }
  func.func @transform_3(%arg0: i32) -> (i32, i32) {
    %c0_i32 = arith.constant 0 : i32
    %c0_i32_0 = arith.constant 0 : i32
    %c0_i32_1 = arith.constant 0 : i32
    return %c0_i32, %c0_i32_0 : i32, i32
  }
  func.func @transform_4(%arg0: i32) -> (i32, i32) {
    %c0_i32 = arith.constant 0 : i32
    %c0_i32_0 = arith.constant 0 : i32
    %c0_i32_1 = arith.constant 0 : i32
    return %c0_i32, %c0_i32_0 : i32, i32
  }
  func.func @transform_5(%arg0: i32) -> (i32, i32) {
    %c0_i32 = arith.constant 0 : i32
    %c0_i32_0 = arith.constant 0 : i32
    %c0_i32_1 = arith.constant 0 : i32
    return %c0_i32, %c0_i32_0 : i32, i32
  }
  func.func @transform_6(%arg0: i32) -> (i32, i32) {
    %c0_i32 = arith.constant 0 : i32
    %c0_i32_0 = arith.constant 0 : i32
    %c0_i32_1 = arith.constant 0 : i32
    return %c0_i32, %c0_i32_0 : i32, i32
  }
  func.func @transform_7(%arg0: i32) -> (i32, i32) {
    %c0_i32 = arith.constant 0 : i32
    %c0_i32_0 = arith.constant 0 : i32
    %c0_i32_1 = arith.constant 0 : i32
    return %c0_i32, %c0_i32_0 : i32, i32
  }
  func.func @transform_8(%arg0: i32) -> (i32, i32) {
    %c0_i32 = arith.constant 0 : i32
    %c0_i32_0 = arith.constant 0 : i32
    %c0_i32_1 = arith.constant 0 : i32
    return %c0_i32, %c0_i32_0 : i32, i32
  }
}

module attributes {stable_mosaic.version = 11 : i64} {
  func.func @kernel(%arg0: i32, %arg1: memref<8x128xf32, #tpu.memory_space<vmem>>, %arg2: memref<128x256xbf16, #tpu.memory_space<vmem>>, %arg3: memref<128x128xbf16, #tpu.memory_space<vmem>>, %arg4: memref<1x128xf32, #tpu.memory_space<vmem>>, %arg5: memref<1x128xf32, #tpu.memory_space<vmem>>, %arg6: memref<1x128xf32, #tpu.memory_space<vmem>>, %arg7: memref<1x128xf32, #tpu.memory_space<vmem>>, %arg8: memref<1x128xf32, #tpu.memory_space<vmem>>, %arg9: memref<128x128xbf16, #tpu.memory_space<vmem>>, %arg10: memref<1x128xf32, #tpu.memory_space<vmem>>, %arg11: memref<8x128xf32, #tpu.memory_space<vmem>>, %arg12: memref<8x256xf32, #tpu.memory_space<vmem>>) attributes {dimension_semantics = [#tpu.dimension_semantics<arbitrary>], iteration_bounds = array<i64: 2>, scalar_prefetch = 0 : i64, scratch_operands = 1 : i64, tpu.core_type = #tpu.core_type<tc>, window_params = [{transform_indices = @transform_0, window_bounds = array<i64: 8, 128>}, {transform_indices = @transform_1, window_bounds = array<i64: 128, 256>}, {pipeline_mode = #tpu.pipeline_mode<synchronous>, transform_indices = @transform_2, window_bounds = array<i64: 128, 128>}, {pipeline_mode = #tpu.pipeline_mode<synchronous>, transform_indices = @transform_3, window_bounds = array<i64: 1, 128>}, {pipeline_mode = #tpu.pipeline_mode<synchronous>, transform_indices = @transform_4, window_bounds = array<i64: 1, 128>}, {pipeline_mode = #tpu.pipeline_mode<synchronous>, transform_indices = @transform_5, window_bounds = array<i64: 1, 128>}, {pipeline_mode = #tpu.pipeline_mode<synchronous>, transform_indices = @transform_6, window_bounds = array<i64: 1, 128>}, {pipeline_mode = #tpu.pipeline_mode<synchronous>, transform_indices = @transform_7, window_bounds = array<i64: 1, 128>}, {pipeline_mode = #tpu.pipeline_mode<synchronous>, transform_indices = @transform_8, window_bounds = array<i64: 128, 128>}, {pipeline_mode = #tpu.pipeline_mode<synchronous>, transform_indices = @transform_9, window_bounds = array<i64: 1, 128>}, {pipeline_mode = #tpu.pipeline_mode<synchronous>, transform_indices = @transform_10, window_bounds = array<i64: 8, 128>}]} {
    %c0_i32 = arith.constant 0 : i32
    %0 = arith.cmpi eq, %arg0, %c0_i32 : i32
    %1 = arith.extui %0 : i1 to i32
    %c0_i32_0 = arith.constant 0 : i32
    %2 = arith.cmpi ne, %1, %c0_i32_0 : i32
    scf.if %2 {
      %cst_9 = arith.constant 0.000000e+00 : f32
      %13 = vector.broadcast %cst_9 : f32 to vector<8x256xf32>
      %c0_10 = arith.constant 0 : index
      %c0_11 = arith.constant 0 : index
      %14 = vector.load %arg12[%c0_10, %c0_11] : memref<8x256xf32, #tpu.memory_space<vmem>>, vector<8x256xf32>
      tpu.vector_store %arg12[%c0_10, %c0_11], %13 {strides = array<i32>} : memref<8x256xf32, #tpu.memory_space<vmem>>, vector<8x256xf32>,
    } else {
    }
    %c0 = arith.constant 0 : index
    %c0_1 = arith.constant 0 : index
    %3 = vector.load %arg12[%c0, %c0_1] : memref<8x256xf32, #tpu.memory_space<vmem>>, vector<8x256xf32>
    %c0_2 = arith.constant 0 : index
    %c0_3 = arith.constant 0 : index
    %4 = vector.load %arg1[%c0_2, %c0_3] : memref<8x128xf32, #tpu.memory_space<vmem>>, vector<8x128xf32>
    %5 = arith.truncf %4 : vector<8x128xf32> to vector<8x128xbf16>
    %c0_4 = arith.constant 0 : index
    %c0_5 = arith.constant 0 : index
    %6 = vector.load %arg2[%c0_4, %c0_5] : memref<128x256xbf16, #tpu.memory_space<vmem>>, vector<128x256xbf16>
    %cst = arith.constant dense<0.000000e+00> : vector<8x256xf32>
    %7 = tpu.matmul %5, %6, %cst {dimension_numbers = #tpu.dot_dimension_numbers<[1], [0], [0], [1], [0, 0, 1, 1], [], []>} : vector<8x128xbf16>, vector<128x256xbf16>, vector<8x256xf32> -> vector<8x256xf32>
    %8 = arith.addf %3, %7 : vector<8x256xf32>
    %c0_6 = arith.constant 0 : index
    %c0_7 = arith.constant 0 : index
    %9 = vector.load %arg12[%c0_6, %c0_7] : memref<8x256xf32, #tpu.memory_space<vmem>>, vector<8x256xf32>
    tpu.vector_store %arg12[%c0_6, %c0_7], %8 {strides = array<i32>} : memref<8x256xf32, #tpu.memory_space<vmem>>, vector<8x256xf32>,
    %c1_i32 = arith.constant 1 : i32
    %10 = arith.cmpi eq, %arg0, %c1_i32 : i32
    %11 = arith.extui %10 : i1 to i32
    %c0_i32_8 = arith.constant 0 : i32
    %12 = arith.cmpi ne, %11, %c0_i32_8 : i32
    scf.if %12 {
      %c0_9 = arith.constant 0 : index
      %c0_10 = arith.constant 0 : index
      %13 = vector.load %arg12[%c0_9, %c0_10] : memref<8x256xf32, #tpu.memory_space<vmem>>, vector<8x256xf32>
      %14 = vector.extract_strided_slice %13 {offsets = [0, 0], sizes = [8, 128], strides = [1, 1]} : vector<8x256xf32> to vector<8x128xf32>
      %c0_11 = arith.constant 0 : index
      %c0_12 = arith.constant 0 : index
      %15 = vector.load %arg4[%c0_11, %c0_12] : memref<1x128xf32, #tpu.memory_space<vmem>>, vector<1x128xf32>
      %16 = vector.broadcast %15 : vector<1x128xf32> to vector<8x128xf32>
      %17 = arith.mulf %14, %16 : vector<8x128xf32>
      %c0_13 = arith.constant 0 : index
      %c0_14 = arith.constant 0 : index
      %18 = vector.load %arg5[%c0_13, %c0_14] : memref<1x128xf32, #tpu.memory_space<vmem>>, vector<1x128xf32>
      %19 = vector.broadcast %18 : vector<1x128xf32> to vector<8x128xf32>
      %20 = arith.addf %17, %19 : vector<8x128xf32>
      %cst_15 = arith.constant 0.000000e+00 : f32
      %21 = vector.broadcast %cst_15 : f32 to vector<8x128xf32>
      %22 = arith.cmpf oge, %20, %21 : vector<8x128xf32>
      %cst_16 = arith.constant 2.000000e-01 : f32
      %23 = vector.broadcast %cst_16 : f32 to vector<8x128xf32>
      %24 = arith.mulf %23, %20 : vector<8x128xf32>
      %25 = arith.select %22, %20, %24 : vector<8x128xi1>, vector<8x128xf32>
      %26 = vector.extract_strided_slice %13 {offsets = [0, 128], sizes = [8, 128], strides = [1, 1]} : vector<8x256xf32> to vector<8x128xf32>
      %c0_17 = arith.constant 0 : index
      %c0_18 = arith.constant 0 : index
      %27 = vector.load %arg8[%c0_17, %c0_18] : memref<1x128xf32, #tpu.memory_space<vmem>>, vector<1x128xf32>
      %28 = vector.broadcast %27 : vector<1x128xf32> to vector<8x128xf32>
      %29 = arith.addf %26, %28 : vector<8x128xf32>
      %cst_19 = arith.constant 0.000000e+00 : f32
      %30 = vector.broadcast %cst_19 : f32 to vector<8x128xf32>
      %31 = arith.cmpf oge, %29, %30 : vector<8x128xf32>
      %cst_20 = arith.constant 2.000000e-01 : f32
      %32 = vector.broadcast %cst_20 : f32 to vector<8x128xf32>
      %33 = arith.mulf %32, %29 : vector<8x128xf32>
      %34 = arith.select %31, %29, %33 : vector<8x128xi1>, vector<8x128xf32>
      %35 = arith.truncf %25 : vector<8x128xf32> to vector<8x128xbf16>
      %c0_21 = arith.constant 0 : index
      %c0_22 = arith.constant 0 : index
      %36 = vector.load %arg3[%c0_21, %c0_22] : memref<128x128xbf16, #tpu.memory_space<vmem>>, vector<128x128xbf16>
      %cst_23 = arith.constant dense<0.000000e+00> : vector<8x128xf32>
      %37 = tpu.matmul %35, %36, %cst_23 {dimension_numbers = #tpu.dot_dimension_numbers<[1], [0], [0], [1], [0, 0, 1, 1], [], []>} : vector<8x128xbf16>, vector<128x128xbf16>, vector<8x128xf32> -> vector<8x128xf32>
      %c0_24 = arith.constant 0 : index
      %c0_25 = arith.constant 0 : index
      %38 = vector.load %arg6[%c0_24, %c0_25] : memref<1x128xf32, #tpu.memory_space<vmem>>, vector<1x128xf32>
      %39 = vector.broadcast %38 : vector<1x128xf32> to vector<8x128xf32>
      %40 = arith.mulf %37, %39 : vector<8x128xf32>
      %c0_26 = arith.constant 0 : index
      %c0_27 = arith.constant 0 : index
      %41 = vector.load %arg7[%c0_26, %c0_27] : memref<1x128xf32, #tpu.memory_space<vmem>>, vector<1x128xf32>
      %42 = vector.broadcast %41 : vector<1x128xf32> to vector<8x128xf32>
      %43 = arith.addf %40, %42 : vector<8x128xf32>
      %44 = arith.addf %43, %34 : vector<8x128xf32>
      %cst_28 = arith.constant 0.000000e+00 : f32
      %45 = vector.broadcast %cst_28 : f32 to vector<8x128xf32>
      %46 = arith.cmpf oge, %44, %45 : vector<8x128xf32>
      %cst_29 = arith.constant 2.000000e-01 : f32
      %47 = vector.broadcast %cst_29 : f32 to vector<8x128xf32>
      %48 = arith.mulf %47, %44 : vector<8x128xf32>
      %49 = arith.select %46, %44, %48 : vector<8x128xi1>, vector<8x128xf32>
      %50 = arith.truncf %49 : vector<8x128xf32> to vector<8x128xbf16>
      %c0_30 = arith.constant 0 : index
      %c0_31 = arith.constant 0 : index
      %51 = vector.load %arg9[%c0_30, %c0_31] : memref<128x128xbf16, #tpu.memory_space<vmem>>, vector<128x128xbf16>
      %cst_32 = arith.constant dense<0.000000e+00> : vector<8x128xf32>
      %52 = tpu.matmul %50, %51, %cst_32 {dimension_numbers = #tpu.dot_dimension_numbers<[1], [0], [0], [1], [0, 0, 1, 1], [], []>} : vector<8x128xbf16>, vector<128x128xbf16>, vector<8x128xf32> -> vector<8x128xf32>
      %c0_33 = arith.constant 0 : index
      %c0_34 = arith.constant 0 : index
      %53 = vector.load %arg10[%c0_33, %c0_34] : memref<1x128xf32, #tpu.memory_space<vmem>>, vector<1x128xf32>
      %54 = vector.broadcast %53 : vector<1x128xf32> to vector<8x128xf32>
      %55 = arith.addf %52, %54 : vector<8x128xf32>
      %c0_35 = arith.constant 0 : index
      %c0_36 = arith.constant 0 : index
      %56 = vector.load %arg11[%c0_35, %c0_36] : memref<8x128xf32, #tpu.memory_space<vmem>>, vector<8x128xf32>
      tpu.vector_store %arg11[%c0_35, %c0_36], %55 {strides = array<i32>} : memref<8x128xf32, #tpu.memory_space<vmem>>, vector<8x128xf32>,
    } else {
    }
    return
  }
  func.func @transform_0(%arg0: i32) -> (i32, i32) {
    %c0_i32 = arith.constant 0 : i32
    %c0_i32_0 = arith.constant 0 : i32
    return %c0_i32, %arg0 : i32, i32
  }
  func.func @transform_1(%arg0: i32) -> (i32, i32) {
    %c0_i32 = arith.constant 0 : i32
    %c0_i32_0 = arith.constant 0 : i32
    return %arg0, %c0_i32 : i32, i32
  }
  func.func @transform_2(%arg0: i32) -> (i32, i32) {
    %c0_i32 = arith.constant 0 : i32
    %c0_i32_0 = arith.constant 0 : i32
    %c0_i32_1 = arith.constant 0 : i32
    return %c0_i32, %c0_i32_0 : i32, i32
  }
  func.func @transform_3(%arg0: i32) -> (i32, i32) {
    %c0_i32 = arith.constant 0 : i32
    %c0_i32_0 = arith.constant 0 : i32
    %c0_i32_1 = arith.constant 0 : i32
    return %c0_i32, %c0_i32_0 : i32, i32
  }
  func.func @transform_4(%arg0: i32) -> (i32, i32) {
    %c0_i32 = arith.constant 0 : i32
    %c0_i32_0 = arith.constant 0 : i32
    %c0_i32_1 = arith.constant 0 : i32
    return %c0_i32, %c0_i32_0 : i32, i32
  }
  func.func @transform_5(%arg0: i32) -> (i32, i32) {
    %c0_i32 = arith.constant 0 : i32
    %c0_i32_0 = arith.constant 0 : i32
    %c0_i32_1 = arith.constant 0 : i32
    return %c0_i32, %c0_i32_0 : i32, i32
  }
  func.func @transform_6(%arg0: i32) -> (i32, i32) {
    %c0_i32 = arith.constant 0 : i32
    %c0_i32_0 = arith.constant 0 : i32
    %c0_i32_1 = arith.constant 0 : i32
    return %c0_i32, %c0_i32_0 : i32, i32
  }
  func.func @transform_7(%arg0: i32) -> (i32, i32) {
    %c0_i32 = arith.constant 0 : i32
    %c0_i32_0 = arith.constant 0 : i32
    %c0_i32_1 = arith.constant 0 : i32
    return %c0_i32, %c0_i32_0 : i32, i32
  }
  func.func @transform_8(%arg0: i32) -> (i32, i32) {
    %c0_i32 = arith.constant 0 : i32
    %c0_i32_0 = arith.constant 0 : i32
    %c0_i32_1 = arith.constant 0 : i32
    return %c0_i32, %c0_i32_0 : i32, i32
  }
  func.func @transform_9(%arg0: i32) -> (i32, i32) {
    %c0_i32 = arith.constant 0 : i32
    %c0_i32_0 = arith.constant 0 : i32
    %c0_i32_1 = arith.constant 0 : i32
    return %c0_i32, %c0_i32_0 : i32, i32
  }
  func.func @transform_10(%arg0: i32) -> (i32, i32) {
    %c0_i32 = arith.constant 0 : i32
    %c0_i32_0 = arith.constant 0 : i32
    %c0_i32_1 = arith.constant 0 : i32
    return %c0_i32, %c0_i32_0 : i32, i32
  }
}

</mosaic_0001>

<bundles_post_ra>
// kernel: _lambda_.5
= control target key start
LH: loop header
LB: loop body
LE: loop exit
PB: predicated region body
PF: predicated region fallthrough
CT: control target
= control target key end

     0   :  { %s1581_s0 = inlined_call_operand.vmem [shape: f32[8,256], index: 0, kind: input, shape index: {}]   ;;  %s1582_s1 = inlined_call_operand.hbm [shape: bf16[256,256], index: 1, kind: input, shape index: {}]   ;;  %s1583_s2 = inlined_call_operand.hbm [shape: bf16[128,128], index: 2, kind: input, shape index: {}]   ;;  %s1584_s3 = inlined_call_operand.vmem [shape: f32[1,128], index: 3, kind: input, shape index: {}]   ;;  %s1585_s4 = inlined_call_operand.vmem [shape: f32[1,128], index: 4, kind: input, shape index: {}]   ;;  %s1586_s5 = inlined_call_operand.vmem [shape: f32[1,128], index: 5, kind: input, shape index: {}]   ;;  %s1587_s6 = inlined_call_operand.vmem [shape: f32[1,128], index: 6, kind: input, shape index: {}]   ;;  %s1588_s7 = inlined_call_operand.vmem [shape: f32[1,128], index: 7, kind: input, shape index: {}]   ;;  %s1589_s8 = inlined_call_operand.hbm [shape: bf16[128,256], index: 8, kind: input, shape index: {}]   ;;  %s1590_s9 = inlined_call_operand.vmem [shape: f32[1,256], index: 9, kind: input, shape index: {}]   ;;  %s1591_s10 = inlined_call_operand.vmem [shape: f32[8,128], index: 10, kind: input, shape index: {}]   ;;  %s1592_s11 = inlined_call_operand.vmem [shape: f32[8,384], index: 11, kind: output, shape index: {}]  }
   0x1   :  { %1595 = sst [smem:[#allocation10_spill]] %s1583_s2 }
   0x2   :  { %1596 = sst [smem:[#allocation11_spill]] %s1589_s8 }
   0x3   :  { %16 = vsyncpa [#allocation4], 0 }
   0x4   :  { %18 = vsyncpa [#allocation4 + $0x1], 0 }
   0x5   :  { %19 = vsyncpa [#allocation6], 0  ;;  %s1398_s17 = smov 0   ;;  %s1400_s18 = smov 0  }
   0x6   :  { %s1402_s19 = smov 0   ;;  %s1404_s20 = smov 0  }
   0x7 LB: > { %s1417_s21 = sadd.s32 4294967295, %s1329_s20   ;;  %p71_p0 = scmp.ne.s32.totalorder %s1321_s18, %s1317_s17  ;;  %s1329_s20 = sphi %s1404_s20, %s1607_s20   ;;  %s1325_s19 = sphi %s1402_s19, %s1606_s19   ;;  %s1321_s18 = sphi %s1400_s18, %s1605_s18   ;;  %s1317_s17 = sphi %s1398_s17, %s1604_s17  }
   0x8   : > { %p72_p1 = scmp.eq.s32.totalorder %s1417_s21, 0  ;;  %p910_p2 = scmp.ge.s32.totalorder %s1329_s20, 1 }
   0x9   : > { %p292_p3 = scmp.lt.s32.totalorder %s1329_s20, 3  ;;  %p911_p4 = scmp.ne.s32.totalorder %s1417_s21, 0 }
   0xa   : > { %p1426_p5 = por %p72_p1, %p71_p0  ;;  %s1598_s2 = sld [smem:[#allocation10_spill]] }
   0xb   : > { %p1433_p6 = pnand %p910_p2, %p292_p3  ;;  %s1331_s27 = smov [#allocation5]  }
   0xc   : > { %s305_s28 = sshll.u32 %s1331_s27, 4  ;;  %s1600_s8 = sld [smem:[#allocation11_spill]]  ;;  %s306_s28 = int_to_ptr.vmem [resolvable:$true] %s305_s28 }
   0xd   : > { %p1139_p7 = pneg %p1433_p6  ;;  %s1332_s13 = smov 64  }
   0xe   : > { %s1333_s14 = smov 4   ;;  %s1334_s15 = smov [#allocation7]  }
   0xf   : > { %p1140_p8 = pnand %p1139_p7, %p72_p1  ;;  %s334_s16 = sshll.u32 %s1334_s15, 4  ;;  %s335_s16 = int_to_ptr.vmem [resolvable:$true] %s334_s16 }
  0x10   : > { %s303_s25 = sshll.u32 %s1598_s2, 4  ;;  %s1593_s17 = smov 128   ;;  %s304_s25 = int_to_ptr.hbm [resolvable:$true] %s303_s25 }
  0x11   : > { %1142 = dma.hbm_to_vmem [thread:$0]  (!%p1140_p8), %s304_s25, 1024, %s306_s28, [#allocation6], %s1332_s13, %s1332_s13, %s1333_s14  }
  0x12   : > { %s332_s12 = sshll.u32 %s1600_s8, 4  ;;  %s1594_s23 = smov 8   ;;  %s333_s12 = int_to_ptr.hbm [resolvable:$true] %s332_s12 }
  0x13   : > { %1145 = dma.hbm_to_vmem [thread:$0]  (!%p1140_p8), %s333_s12, 2048, %s335_s16, [#allocation6], %s1593_s17, %s1593_s17, %s1594_s23  }
  0x14   : > { %s1448_s24 = sadd.s32 1, %s1329_s20   ;;  %s58_s29 = sadd.s32 1, %s1325_s19 }
  0x15   : > { %s55_s27 = ssub.s32 %s1329_s20, %s1448_s24  ;;  %p65_p10 = scmp.ne.s32.totalorder %s1325_s19, %s1321_s18 }
  0x16   : > { %p56_p9 = scmp.eq.s32.totalorder %s55_s27, 0  ;;  %p66_p11 = scmp.eq.s32.totalorder %s1329_s20, 0 }
  0x17   : > { %s361_s28 = sand.u32 1, %s1325_s19   ;;  %s1088_s30 = sshll.u32 %s1329_s20, 7 }
  0x18   : > { %s1457_s25 = scalar_select %p56_p9, %s1325_s19, %s58_s29  }
  0x19   : > { %p67_p12 = por %p66_p11, %p65_p10  ;;  %p1152_p13 = scmp.lt.s32.totalorder %s1329_s20, 2 }
  0x1a   : > { %s914_s13 = sshll.u32 %s361_s28, 7  ;;  %s371_s2 = scalar_lea.hbm %s1582_s1, %s1088_s30 }
  0x1b   : > { %s372_s12 = sshll.u32 %s371_s2, 4  ;;  %s365_s16 = scalar_lea.vmem [#allocation3], %s914_s13  ;;  %s373_s12 = int_to_ptr.hbm [resolvable:$true] %s372_s12 }
  0x1c   : > { %s374_s17 = sshll.u32 %s365_s16, 4  ;;  %p1465_p0 = pnand %p1152_p13, %p67_p12  ;;  %s375_s17 = int_to_ptr.vmem [resolvable:$true] %s374_s17 }
  0x1d   : > { %s362_s29 = scalar_lea.sflag [#allocation4], %s361_s28  ;;  %s1261_s23 = sshra.s32 %s373_s12, 4  ;;  %s1262_s23 = int_to_ptr.hbm [resolvable:$true] %s1261_s23 }
  0x1e   : > { %s1263_s8 = scalar_lea.hbm %s1262_s23, 128  ;;  %p1265_p3 = pneg %p1465_p0 }
  0x1f   : > { %p1264_p2 = scmp.ne.s32.totalorder %s1262_s23, %s1263_s8  ;;  %s1268_s30 = scalar_lea.hbm %s1582_s1, 256 }
  0x20   : > { %p1269_p9 = scmp.lt.s32.totalorder %s1262_s23, %s1582_s1  ;;  %p1270_p10 = scmp.lt.s32.totalorder %s1268_s30, %s1263_s8 }
  0x21   : > { %p1266_p7 = pnand %p1265_p3, %p1264_p2 }
  0x22   : > { %p1271_p11 = por %p1270_p10, %p1269_p9 }
  0x23   : > { %p1267_p8 = pneg %p1266_p7 }
  0x25   : > { %p1272_p12 = pnand %p1271_p11, %p1267_p8 }
  0x27   : > { %1275 = shalt.err (!%p1272_p12)
}
  0x28   : > { %s1602_s28 = smov 8   ;;  %s1603_s15 = smov 128  }
  0x29   : > { %1149 = dma.hbm_to_vmem [thread:$0]  (!%p1465_p0), %s373_s12, 2048, %s375_s17, %s362_s29, %s1603_s15, %s1603_s15, %s1602_s28  }
  0x2a   : > { %386 = sbr.rel (%p1433_p6) target bundleno = 547 (0x223), region = 64  ;;  %s388_s16 = sand.u32 (!%p1433_p6), 1, %s1321_s18  }
  0x2b   : > { %s919_s20 = sshll.u32 (!%p1433_p6), %s388_s16, 7  ;;  %s389_s2 = scalar_lea.sflag (!%p1433_p6), [#allocation4], %s388_s16 }
  0x2c   : > { %s1485_s13 = scalar_lea.vmem (!%p1433_p6), [#allocation3], %s919_s20 }
  0x2f   : > { %1308 = dma.done.wait (%p1426_p5), %s389_s2, 2048  }
  0x30   : > { %1310 = vsyncadd (%p1426_p5), %s389_s2, 4294965248 }
  0x31   : > { %1312 = dma.done.wait (%p72_p1), [#allocation6], 3072  }
  0x32   : > { %1314 = vsyncadd (%p72_p1), [#allocation6], 4294964224  ;;  %p441_p6 = scmp.lt.s32.totalorder %s1417_s21, 1 }
  0x33   : > { %449 = sbr.rel (%p911_p4) target bundleno = 59 (0x3b), region = 80 }
  0x34   : > { %s442_s8 = scalar_select %p441_p6, %s1417_s21, 1 }
  0x36   : > { %s922_s26 = sshll.u32 %s442_s8, 3 }
  0x37   : > { %s1500_s12 = scalar_lea.vmem %s1581_s0, %s922_s26 }
  0x38   : > { %v1337_v0 = vmov 0.0  }
  0x39   : > { %450 = vst [vmem:[#allocation2] sm:$0xff] %v1337_v0 }
  0x3a   : > { %451 = vst [vmem:[#allocation2 + $0x8] sm:$0xff] %v1337_v0 }
  0x3b PF: > { %v982_v1 = vld [vmem:[%s1485_s13 + $0x70] sm:$0xf]  ;;  %v1104_v2 = vld [vmem:[%s1485_s13 + $0x74] sm:$0xf0]  ;;  %v1103_v3 = vld [vmem:[%s1485_s13 + $0x74] sm:$0xf] }
  0x3c   : > { %v983_v4 = vor.u32 %v1104_v2, %v982_v1  ;;  %v984_v5 = vld [vmem:[%s1485_s13 + $0x78] sm:$0xf0]  ;;  %v974_v6 = vld [vmem:[%s1485_s13 + $0x60] sm:$0xf]  ;;  %v1102_v7 = vld [vmem:[%s1485_s13 + $0x64] sm:$0xf0] }
  0x3d   : > { %v987_v8 = vor.u32 %v1103_v3, %v984_v5  ;;  %v1101_v9 = vld [vmem:[%s1485_s13 + $0x64] sm:$0xf]  ;;  %v976_v10 = vld [vmem:[%s1485_s13 + $0x68] sm:$0xf0]  ;;  %v975_v11 = vor.u32 %v1102_v7, %v974_v6  ;;  %v966_v13 = vld [vmem:[%s1485_s13 + $0x50] sm:$0xf] }
  0x3e   : > { %552 = vmatpush.bf16.msra.mxu0 %v983_v4  ;;  %v979_v12 = vor.u32 %v1101_v9, %v976_v10  ;;  %v1100_v14 = vld [vmem:[%s1485_s13 + $0x54] sm:$0xf0]  ;;  %v1099_v15 = vld [vmem:[%s1485_s13 + $0x54] sm:$0xf]  ;;  %v968_v16 = vld [vmem:[%s1485_s13 + $0x58] sm:$0xf0] }
  0x3f   : > { %565 = vmatpush.bf16.msra.mxu1 %v987_v8  ;;  %v967_v17 = vor.u32 %v1100_v14, %v966_v13  ;;  %v971_v18 = vor.u32 %v1099_v15, %v968_v16  ;;  %v958_v19 = vld [vmem:[%s1485_s13 + $0x40] sm:$0xf]  ;;  %v1098_v20 = vld [vmem:[%s1485_s13 + $0x44] sm:$0xf0]  ;;  %v1097_v21 = vld [vmem:[%s1485_s13 + $0x44] sm:$0xf] }
  0x40   : > { %v960_v22 = vld [vmem:[%s1485_s13 + $0x48] sm:$0xf0]  ;;  %v959_v23 = vor.u32 %v1098_v20, %v958_v19  ;;  %v950_v25 = vld [vmem:[%s1485_s13 + $0x30] sm:$0xf]  ;;  %v1096_v26 = vld [vmem:[%s1485_s13 + $0x34] sm:$0xf0] }
  0x41   : > { %v963_v24 = vor.u32 %v1097_v21, %v960_v22  ;;  %v1095_v27 = vld [vmem:[%s1485_s13 + $0x34] sm:$0xf]  ;;  %v952_v28 = vld [vmem:[%s1485_s13 + $0x38] sm:$0xf0]  ;;  %v951_v29 = vor.u32 %v1096_v26, %v950_v25  ;;  %v942_v31 = vld [vmem:[%s1485_s13 + $0x20] sm:$0xf] }
  0x42   : > { %553 = vmatpush.bf16.msra.mxu0 %v975_v11  ;;  %v955_v30 = vor.u32 %v1095_v27, %v952_v28  ;;  %v1094_v32 = vld [vmem:[%s1485_s13 + $0x24] sm:$0xf0]  ;;  %v1093_v33 = vld [vmem:[%s1485_s13 + $0x24] sm:$0xf]  ;;  %v944_v34 = vld [vmem:[%s1485_s13 + $0x28] sm:$0xf0] }
  0x43   : > { %566 = vmatpush.bf16.msra.mxu1 %v979_v12  ;;  %v943_v35 = vor.u32 %v1094_v32, %v942_v31  ;;  %v947_v36 = vor.u32 %v1093_v33, %v944_v34  ;;  %v934_v37 = vld [vmem:[%s1485_s13 + $0x10] sm:$0xf]  ;;  %v1092_v38 = vld [vmem:[%s1485_s13 + $0x14] sm:$0xf0]  ;;  %v1091_v39 = vld [vmem:[%s1485_s13 + $0x14] sm:$0xf] }
  0x44   : > { %v936_v40 = vld [vmem:[%s1485_s13 + $0x18] sm:$0xf0]  ;;  %v935_v41 = vor.u32 %v1092_v38, %v934_v37  ;;  %v926_v43 = vld [vmem:[%s1485_s13] sm:$0xf]  ;;  %v1090_v44 = vld [vmem:[%s1485_s13 + $0x4] sm:$0xf0] }
  0x45   : > { %v939_v42 = vor.u32 %v1091_v39, %v936_v40  ;;  %v1089_v45 = vld [vmem:[%s1485_s13 + $0x4] sm:$0xf]  ;;  %v928_v46 = vld [vmem:[%s1485_s13 + $0x8] sm:$0xf0]  ;;  %v927_v47 = vor.u32 %v1090_v44, %v926_v43  ;;  %v454_v48 = vld [vmem:[%s1500_s12] sm:$0xff]  ;;  %p988_p1 = scmp.ne.s32.totalorder %s1417_s21, 1 }
  0x46   : > { %554 = vmatpush.bf16.msra.mxu0 %v967_v17  ;;  %v931_v49 = vor.u32 %v1089_v45, %v928_v46  ;;  %v455_v50 = vpack.c.bf16 %v454_v48, %v454_v48  ;;  %v452_v51 = vld [vmem:[#allocation2] sm:$0xff]  ;;  %v453_v52 = vld [vmem:[#allocation2 + $0x8] sm:$0xff] }
  0x47   : > { %567 = vmatpush.bf16.msra.mxu1 %v971_v18 }
  0x4a   : > { %555 = vmatpush.bf16.msra.mxu0 %v959_v23 }
  0x4b   : > { %568 = vmatpush.bf16.msra.mxu1 %v963_v24 }
  0x4e   : > { %556 = vmatpush.bf16.msra.mxu0 %v951_v29 }
  0x4f   : > { %569 = vmatpush.bf16.msra.mxu1 %v955_v30 }
  0x52   : > { %557 = vmatpush.bf16.msra.mxu0 %v943_v35 }
  0x53   : > { %570 = vmatpush.bf16.msra.mxu1 %v947_v36 }
  0x56   : > { %558 = vmatpush.bf16.msra.mxu0 %v935_v41 }
  0x57   : > { %571 = vmatpush.bf16.msra.mxu1 %v939_v42 }
  0x5a   : > { %559 = vmatpush.bf16.msra.mxu0 %v927_v47 }
  0x5b   : > { %572 = vmatpush.bf16.msra.mxu1 %v931_v49 }
  0x5d   : > { %560 = vmatmul.bf16.vlgmr.msra.gmra.mxu0 %v455_v50 }
  0x5e   : > { %573 = vmatmul.bf16.vlgmr.msra.gmra.mxu1 %v455_v50 }
  0xda   : > { %v561_v53 = vpop.f32.mrf.mxu0 }
  0xdb   : > { %v578_v54 = vadd.f32 %v561_v53, %v452_v51  ;;  %v574_v55 = vpop.f32.mrf.mxu1 }
  0xdc   : > { %v579_v56 = vadd.f32 %v574_v55, %v453_v52 }
  0xdd   : > { %580 = vst [vmem:[#allocation2] sm:$0xff] %v578_v54 }
  0xde   : > { %581 = vst [vmem:[#allocation2 + $0x8] sm:$0xff] %v579_v56 }
  0xdf   : > { %585 = sbr.rel (%p988_p1) target bundleno = 547 (0x223), region = 84 }
  0xe2   : > { %v563_v57 = vpop.f32.mrf.mxu0 }
  0xe3   : > { %v576_v58 = vpop.f32.mrf.mxu1 }
  0xe4   : > { %v1112_v59 = vld [vmem:[#allocation5 + $0x38] sm:$0xff]  ;;  %v1111_v60 = vld [vmem:[#allocation5 + $0x30] sm:$0xff]  ;;  %v1110_v61 = vld [vmem:[#allocation5 + $0x28] sm:$0xff] }
  0xe5   : > { %674 = vmatpush.bf16.msra.mxu0 %v1112_v59  ;;  %v1079_v62 = vld [vmem:[#allocation7 + $0x70] sm:$0xf]  ;;  %v1128_v63 = vld [vmem:[#allocation7 + $0x74] sm:$0xf0]  ;;  %v1127_v1 = vld [vmem:[#allocation7 + $0x74] sm:$0xf] }
  0xe6   : > { %v1080_v0 = vor.u32 %v1128_v63, %v1079_v62  ;;  %v1081_v2 = vld [vmem:[#allocation7 + $0x78] sm:$0xf0]  ;;  %v1071_v3 = vld [vmem:[#allocation7 + $0x60] sm:$0xf]  ;;  %v1126_v5 = vld [vmem:[#allocation7 + $0x64] sm:$0xf0] }
  0xe7   : > { %v1084_v4 = vor.u32 %v1127_v1, %v1081_v2  ;;  %v1125_v6 = vld [vmem:[#allocation7 + $0x64] sm:$0xf]  ;;  %v1073_v7 = vld [vmem:[#allocation7 + $0x68] sm:$0xf0]  ;;  %v1072_v8 = vor.u32 %v1126_v5, %v1071_v3  ;;  %v1063_v10 = vld [vmem:[#allocation7 + $0x50] sm:$0xf] }
  0xe8   : > { %804 = vmatpush.bf16.msra.mxu1 %v1080_v0  ;;  %v1076_v9 = vor.u32 %v1125_v6, %v1073_v7  ;;  %v1124_v11 = vld [vmem:[#allocation7 + $0x54] sm:$0xf0]  ;;  %v1123_v12 = vld [vmem:[#allocation7 + $0x54] sm:$0xf]  ;;  %v1065_v13 = vld [vmem:[#allocation7 + $0x58] sm:$0xf0] }
  0xe9   : > { %675 = vmatpush.bf16.msra.mxu0 %v1111_v60  ;;  %817 = vmatpush.bf16.msra.mxu2 %v1084_v4  ;;  %v1109_v14 = vld [vmem:[#allocation5 + $0x20] sm:$0xff]  ;;  %v1194_v15 = vld [vmem:[%s1584_s3] ss:$0 sm:$0xff]  ;;  %v1064_v17 = vor.u32 %v1124_v11, %v1063_v10  ;;  %v1068_v19 = vor.u32 %v1123_v12, %v1065_v13  ;;  %v1122_v20 = vld [vmem:[#allocation7 + $0x44] sm:$0xf0] }
  0xea   : > { %v586_v16 = vld [vmem:[#allocation2] sm:$0xff]  ;;  %v1055_v18 = vld [vmem:[#allocation7 + $0x40] sm:$0xf]  ;;  %v1121_v21 = vld [vmem:[#allocation7 + $0x44] sm:$0xf] }
  0xeb   : > { %v1057_v22 = vld [vmem:[#allocation7 + $0x48] sm:$0xf0]  ;;  %v1108_v23 = vld [vmem:[#allocation5 + $0x18] sm:$0xff]  ;;  %v592_v24 = vmul.f32 %v1194_v15, %v586_v16  ;;  %v1195_v25 = vld [vmem:[%s1585_s4] ss:$0 sm:$0xff]  ;;  %v1056_v26 = vor.u32 %v1122_v20, %v1055_v18 }
  0xec   : > { %805 = vmatpush.bf16.msra.mxu1 %v1072_v8  ;;  %v1060_v27 = vor.u32 %v1121_v21, %v1057_v22  ;;  %v1047_v28 = vld [vmem:[#allocation7 + $0x30] sm:$0xf]  ;;  %v1120_v29 = vld [vmem:[#allocation7 + $0x34] sm:$0xf0]  ;;  %v1119_v30 = vld [vmem:[#allocation7 + $0x34] sm:$0xf] }
  0xed   : > { %676 = vmatpush.bf16.msra.mxu0 %v1110_v61  ;;  %818 = vmatpush.bf16.msra.mxu2 %v1076_v9  ;;  %v1049_v31 = vld [vmem:[#allocation7 + $0x38] sm:$0xf0]  ;;  %v1107_v32 = vld [vmem:[#allocation5 + $0x10] sm:$0xff]  ;;  %v597_v33 = vadd.f32 %v1195_v25, %v592_v24  ;;  %v1048_v34 = vor.u32 %v1120_v29, %v1047_v28  ;;  %v1106_v36 = vld [vmem:[#allocation5 + $0x8] sm:$0xff] }
  0xee   : > { %v1052_v35 = vor.u32 %v1119_v30, %v1049_v31  ;;  %v1105_v38 = vld [vmem:[#allocation5] sm:$0xff]  ;;  %v1118_v42 = vld [vmem:[#allocation7 + $0x24] sm:$0xf0]  ;;  %v1041_v45 = vld [vmem:[#allocation7 + $0x28] sm:$0xf0] }
  0xef   : > { %v599_v37 = vmul.f32 0.2, %v597_v33  ;;  %vm598_vm0 = vcmp.ge.f32.partialorder %v597_v33, 0.0  ;;  %v1039_v41 = vld [vmem:[#allocation7 + $0x20] sm:$0xf]  ;;  %v587_v60 = vld [vmem:[#allocation2 + $0x8] sm:$0xff] }
  0xf0   : > { %806 = vmatpush.bf16.msra.mxu1 %v1064_v17  ;;  %v1117_v43 = vld [vmem:[#allocation7 + $0x24] sm:$0xf]  ;;  %v1040_v44 = vor.u32 %v1118_v42, %v1039_v41  ;;  %v1031_v47 = vld [vmem:[#allocation7 + $0x10] sm:$0xf]  ;;  %v1116_v48 = vld [vmem:[#allocation7 + $0x14] sm:$0xf0] }
  0xf1   : > { %677 = vmatpush.bf16.msra.mxu0 %v1109_v14  ;;  %819 = vmatpush.bf16.msra.mxu2 %v1068_v19  ;;  %v600_v39 = vsel %vm598_vm0, %v597_v33, %v599_v37  ;;  %v1044_v46 = vor.u32 %v1117_v43, %v1041_v45  ;;  %v1115_v49 = vld [vmem:[#allocation7 + $0x14] sm:$0xf]  ;;  %v1032_v50 = vor.u32 %v1116_v48, %v1031_v47  ;;  %v1033_v51 = vld [vmem:[#allocation7 + $0x18] sm:$0xf0]  ;;  %v1023_v53 = vld [vmem:[#allocation7] sm:$0xf] }
  0xf2   : > { %v609_v40 = vpack.c.bf16 %v600_v39, %v600_v39  ;;  %v1036_v52 = vor.u32 %v1115_v49, %v1033_v51  ;;  %v1114_v54 = vld [vmem:[#allocation7 + $0x4] sm:$0xf0]  ;;  %v1113_v55 = vld [vmem:[#allocation7 + $0x4] sm:$0xf]  ;;  %v1025_v57 = vld [vmem:[#allocation7 + $0x8] sm:$0xf0] }
  0xf3   : > { %v1024_v56 = vor.u32 %v1114_v54, %v1023_v53  ;;  %v1028_v58 = vor.u32 %v1113_v55, %v1025_v57  ;;  %v1196_v59 = vld [vmem:[%s1588_s7] ss:$0 sm:$0xff] }
  0xf4   : > { %807 = vmatpush.bf16.msra.mxu1 %v1056_v26  ;;  %v605_v61 = vadd.f32 %v1196_v59, %v587_v60  ;;  %v1197_v62 = vld [vmem:[%s1586_s5] ss:$0 sm:$0xff] }
  0xf5   : > { %678 = vmatpush.bf16.msra.mxu0 %v1108_v23  ;;  %820 = vmatpush.bf16.msra.mxu2 %v1060_v27  ;;  %v1198_v0 = vld [vmem:[%s1587_s6] ss:$0 sm:$0xff] }
  0xf6   : > { %v607_v63 = vmul.f32 0.2, %v605_v61  ;;  %vm606_vm1 = vcmp.ge.f32.partialorder %v605_v61, 0.0  ;;  %v718_v10 = vld [vmem:[%s1590_s9] sm:$0x3] }
  0xf7   : > { %v720_v11 = vperm.slane %v718_v10, 0  ;;  %v721_v14 = vperm.slane %v718_v10, 1  ;;  %v833_v21 = vld [vmem:[%s1591_s10] sm:$0xff] }
  0xf8   : > { %808 = vmatpush.bf16.msra.mxu1 %v1048_v34  ;;  %v608_v3 = vsel %vm606_vm1, %v605_v61, %v607_v63 }
  0xf9   : > { %679 = vmatpush.bf16.msra.mxu0 %v1107_v32  ;;  %821 = vmatpush.bf16.msra.mxu2 %v1052_v35 }
  0xfc   : > { %809 = vmatpush.bf16.msra.mxu1 %v1040_v44 }
  0xfd   : > { %680 = vmatpush.bf16.msra.mxu0 %v1106_v36  ;;  %822 = vmatpush.bf16.msra.mxu2 %v1044_v46 }
 0x100   : > { %810 = vmatpush.bf16.msra.mxu1 %v1032_v50 }
 0x101   : > { %681 = vmatpush.bf16.msra.mxu0 %v1105_v38  ;;  %823 = vmatpush.bf16.msra.mxu2 %v1036_v52 }
 0x104   : > { %682 = vmatmul.bf16.vlgmr.msra.gmra.mxu0 %v609_v40  ;;  %811 = vmatpush.bf16.msra.mxu1 %v1024_v56 }
 0x105   : > { %824 = vmatpush.bf16.msra.mxu2 %v1028_v58 }
 0x181   : > { %v683_v1 = vpop.f32.mrf.mxu0 }
 0x182   : > { %v691_v2 = vmul.f32 %v1197_v62, %v683_v1 }
 0x184   : > { %v696_v4 = vadd.f32 %v1198_v0, %v691_v2 }
 0x186   : > { %v697_v5 = vadd.f32 %v696_v4, %v608_v3 }
 0x188   : > { %vm698_vm2 = vcmp.ge.f32.partialorder %v697_v5, 0.0  ;;  %v699_v6 = vmul.f32 0.2, %v697_v5 }
 0x189   : > { %v685_v7 = vpop.f32.mrf.mxu0 }
 0x18a   : > { %v700_v8 = vsel %vm698_vm2, %v697_v5, %v699_v6 }
 0x18b   : > { %v701_v9 = vpack.c.bf16 %v700_v8, %v700_v8 }
 0x18d   : > { %812 = vmatmul.bf16.vlgmr.msra.gmra.mxu1 %v701_v9  ;;  %825 = vmatmul.bf16.vlgmr.msra.gmra.mxu2 %v701_v9 }
 0x20a   : > { %v813_v12 = vpop.f32.mrf.mxu1 }
 0x20b   : > { %v814_v13 = vadd.f32 %v813_v12, %v720_v11 }
 0x20d   : > { %836 = vst [vmem:[%s1592_s11] sm:$0xff] %v814_v13 }
 0x210   : > { %v826_v15 = vpop.f32.mrf.mxu2 }
 0x211   : > { %v827_v16 = vadd.f32 %v826_v15, %v721_v14 }
 0x212   : > { %v815_v17 = vpop.f32.mrf.mxu1 }
 0x213   : > { %v830_v18 = vmul.f32 0.5, %v827_v16  ;;  %837 = vst [vmem:[%s1592_s11 + $0x8] sm:$0xff] %v827_v16 }
 0x215   : > { %v831_v19 = vmul.f32 1.442695, %v830_v18 }
 0x217   : > { %1199 = vpow2.f32 %v831_v19 }
 0x218   : > { %v828_v20 = vpop.f32.mrf.mxu2 }
 0x21d   : > { %v1200_v22 = vpop.eup %1199 }
 0x21e   : > { %v834_v23 = vmul.f32 %v1200_v22, %v833_v21 }
 0x220   : > { %v835_v24 = vadd.f32 %v834_v23, %v814_v13 }
 0x222   : > { %838 = vst [vmem:[%s1592_s11 + $0x10] sm:$0xff] %v835_v24 }
 0x223 PF: > { %p22_p4 = scmp.ge.s32.totalorder %s1448_s24, 4   ;;  %s1604_s17 = smov %s1321_s18 }
 0x224   : > { %s1605_s18 = smov %s1325_s19  ;;  %s1606_s19 = smov %s1457_s25 }
 0x225   : > { %s1607_s20 = smov %s1448_s24  ;;  %24 = sbr.rel (!%p22_p4) target bundleno = 7 (0x7), region = 119 }
 0x22a   :  { %850 = vsyncpa [#allocation4], 1 }
 0x22b   :  { %852 = vsyncpa [#allocation4 + $0x1], 1 }
 0x22c   :  { %853 = vsyncpa [#allocation6], 1 }

// kernel: _lambda_.4
= control target key start
LH: loop header
LB: loop body
LE: loop exit
PB: predicated region body
PF: predicated region fallthrough
CT: control target
= control target key end

     0   :  { %13 = vsyncpa [#allocation4], 0  ;;  %s583_s0 = inlined_call_operand.vmem [shape: f32[8,128], index: 0, kind: input, shape index: {}]   ;;  %s584_s1 = inlined_call_operand.hbm [shape: bf16[128,256], index: 1, kind: input, shape index: {}]   ;;  %s585_s2 = inlined_call_operand.hbm [shape: bf16[128,128], index: 2, kind: input, shape index: {}]   ;;  %s586_s3 = inlined_call_operand.vmem [shape: f32[1,128], index: 3, kind: input, shape index: {}]   ;;  %s587_s4 = inlined_call_operand.vmem [shape: f32[1,128], index: 4, kind: input, shape index: {}]   ;;  %s588_s5 = inlined_call_operand.vmem [shape: f32[1,128], index: 5, kind: input, shape index: {}]   ;;  %s589_s6 = inlined_call_operand.vmem [shape: f32[1,128], index: 6, kind: input, shape index: {}]   ;;  %s590_s7 = inlined_call_operand.vmem [shape: f32[1,128], index: 7, kind: input, shape index: {}]   ;;  %s591_s8 = inlined_call_operand.vmem [shape: f32[8,128], index: 8, kind: output, shape index: {}]  }
   0x1   :  { %s21_s29 = sshll.u32 %s584_s1, 4  ;;  %s22_s29 = int_to_ptr.hbm [resolvable:$true] %s21_s29 }
   0x2   :  { %14 = vsyncpa [#allocation6], 0  ;;  %s505_s30 = smov [#allocation3]   ;;  %s34_s12 = sshll.u32 %s585_s2, 4  ;;  %s35_s12 = int_to_ptr.hbm [resolvable:$true] %s34_s12 }
   0x3   :  { %s23_s9 = sshll.u32 %s505_s30, 4  ;;  %s506_s13 = smov 128   ;;  %s24_s9 = int_to_ptr.vmem [resolvable:$true] %s23_s9 }
   0x4   :  { %s507_s14 = smov 8   ;;  %s508_s15 = smov [#allocation5]  }
   0x5   :  { %29 = dma.hbm_to_vmem [thread:$0]  %s22_s29, 2048, %s24_s9, [#allocation4], %s506_s13, %s506_s13, %s507_s14  }
   0x6   :  { %s36_s16 = sshll.u32 %s508_s15, 4  ;;  %s509_s17 = smov 64   ;;  %s37_s16 = int_to_ptr.vmem [resolvable:$true] %s36_s16 }
   0x7   :  { %s510_s18 = smov 4  }
   0x8   :  { %42 = dma.hbm_to_vmem [thread:$0]  %s35_s12, 1024, %s37_s16, [#allocation6], %s509_s17, %s509_s17, %s510_s18  }
   0x9   :  { %501 = dma.done.wait [#allocation4], 2048  }
   0xa   :  { %502 = vsyncadd [#allocation4], 4294965248 }
   0xb   :  { %503 = dma.done.wait [#allocation6], 1024  }
   0xc   :  { %504 = vsyncadd [#allocation6], 4294966272  ;;  %v380_v0 = vld [vmem:[#allocation3 + $0x70] sm:$0xf]  ;;  %v433_v1 = vld [vmem:[#allocation3 + $0x74] sm:$0xf0] }
   0xd   :  { %v372_v2 = vld [vmem:[#allocation3 + $0x60] sm:$0xf]  ;;  %v381_v3 = vor.u32 %v433_v1, %v380_v0  ;;  %v431_v4 = vld [vmem:[#allocation3 + $0x64] sm:$0xf0]  ;;  %v364_v6 = vld [vmem:[#allocation3 + $0x50] sm:$0xf] }
   0xe   :  { %v373_v5 = vor.u32 %v431_v4, %v372_v2  ;;  %v429_v7 = vld [vmem:[#allocation3 + $0x54] sm:$0xf0]  ;;  %v432_v8 = vld [vmem:[#allocation3 + $0x74] sm:$0xf]  ;;  %v382_v9 = vld [vmem:[#allocation3 + $0x78] sm:$0xf0] }
   0xf   :  { %167 = vmatpush.bf16.msra.mxu0 %v381_v3  ;;  %v441_v10 = vld [vmem:[#allocation5 + $0x38] sm:$0xff]  ;;  %v430_v11 = vld [vmem:[#allocation3 + $0x64] sm:$0xf]  ;;  %v365_v12 = vor.u32 %v429_v7, %v364_v6  ;;  %v385_v13 = vor.u32 %v432_v8, %v382_v9  ;;  %v374_v14 = vld [vmem:[#allocation3 + $0x68] sm:$0xf0] }
  0x10   :  { %v356_v15 = vld [vmem:[#allocation3 + $0x40] sm:$0xf]  ;;  %v427_v16 = vld [vmem:[#allocation3 + $0x44] sm:$0xf0]  ;;  %288 = vmatpush.bf16.msra.mxu2 %v441_v10  ;;  %v440_v17 = vld [vmem:[#allocation5 + $0x30] sm:$0xff]  ;;  %v377_v18 = vor.u32 %v430_v11, %v374_v14 }
  0x11   :  { %180 = vmatpush.bf16.msra.mxu1 %v385_v13  ;;  %v348_v19 = vld [vmem:[#allocation3 + $0x30] sm:$0xf]  ;;  %v428_v20 = vld [vmem:[#allocation3 + $0x54] sm:$0xf]  ;;  %v366_v21 = vld [vmem:[#allocation3 + $0x58] sm:$0xf0]  ;;  %v357_v22 = vor.u32 %v427_v16, %v356_v15 }
  0x12   :  { %v425_v23 = vld [vmem:[#allocation3 + $0x34] sm:$0xf0]  ;;  %v439_v24 = vld [vmem:[#allocation5 + $0x28] sm:$0xff]  ;;  %v369_v25 = vor.u32 %v428_v20, %v366_v21  ;;  %v426_v26 = vld [vmem:[#allocation3 + $0x44] sm:$0xf] }
  0x13   :  { %168 = vmatpush.bf16.msra.mxu0 %v373_v5  ;;  %v358_v27 = vld [vmem:[#allocation3 + $0x48] sm:$0xf0]  ;;  %v349_v28 = vor.u32 %v425_v23, %v348_v19  ;;  %v340_v29 = vld [vmem:[#allocation3 + $0x20] sm:$0xf]  ;;  %v423_v30 = vld [vmem:[#allocation3 + $0x24] sm:$0xf0] }
  0x14   :  { %289 = vmatpush.bf16.msra.mxu2 %v440_v17  ;;  %v438_v31 = vld [vmem:[#allocation5 + $0x20] sm:$0xff]  ;;  %v361_v32 = vor.u32 %v426_v26, %v358_v27  ;;  %v424_v33 = vld [vmem:[#allocation3 + $0x34] sm:$0xf]  ;;  %v350_v34 = vld [vmem:[#allocation3 + $0x38] sm:$0xf0]  ;;  %v341_v35 = vor.u32 %v423_v30, %v340_v29 }
  0x15   :  { %181 = vmatpush.bf16.msra.mxu1 %v377_v18  ;;  %v332_v36 = vld [vmem:[#allocation3 + $0x10] sm:$0xf]  ;;  %v421_v37 = vld [vmem:[#allocation3 + $0x14] sm:$0xf0]  ;;  %v353_v39 = vor.u32 %v424_v33, %v350_v34  ;;  %v422_v40 = vld [vmem:[#allocation3 + $0x24] sm:$0xf] }
  0x16   :  { %v437_v38 = vld [vmem:[#allocation5 + $0x18] sm:$0xff]  ;;  %v342_v41 = vld [vmem:[#allocation3 + $0x28] sm:$0xf0]  ;;  %v333_v42 = vor.u32 %v421_v37, %v332_v36  ;;  %v324_v43 = vld [vmem:[#allocation3] sm:$0xf] }
  0x17   :  { %169 = vmatpush.bf16.msra.mxu0 %v365_v12  ;;  %v419_v44 = vld [vmem:[#allocation3 + $0x4] sm:$0xf0]  ;;  %v436_v45 = vld [vmem:[#allocation5 + $0x10] sm:$0xff]  ;;  %v345_v46 = vor.u32 %v422_v40, %v342_v41  ;;  %v69_v48 = vld [vmem:[%s583_s0] sm:$0xff] }
  0x18   :  { %290 = vmatpush.bf16.msra.mxu2 %v439_v24  ;;  %v325_v47 = vor.u32 %v419_v44, %v324_v43  ;;  %v70_v49 = vpack.c.bf16 %v69_v48, %v69_v48  ;;  %v420_v50 = vld [vmem:[#allocation3 + $0x14] sm:$0xf]  ;;  %v334_v51 = vld [vmem:[#allocation3 + $0x18] sm:$0xf0]  ;;  %v435_v53 = vld [vmem:[#allocation5 + $0x8] sm:$0xff] }
  0x19   :  { %182 = vmatpush.bf16.msra.mxu1 %v369_v25  ;;  %v337_v52 = vor.u32 %v420_v50, %v334_v51  ;;  %v418_v54 = vld [vmem:[#allocation3 + $0x4] sm:$0xf]  ;;  %v326_v55 = vld [vmem:[#allocation3 + $0x8] sm:$0xf0]  ;;  %v448_v58 = vld [vmem:[%s586_s3] ss:$0 sm:$0xff] }
  0x1a   :  { %v329_v56 = vor.u32 %v418_v54, %v326_v55  ;;  %v434_v57 = vld [vmem:[#allocation5] sm:$0xff] }
  0x1b   :  { %170 = vmatpush.bf16.msra.mxu0 %v357_v22  ;;  %v449_v59 = vld [vmem:[%s587_s4] ss:$0 sm:$0xff] }
  0x1c   :  { %291 = vmatpush.bf16.msra.mxu2 %v438_v31  ;;  %v450_v5 = vld [vmem:[%s590_s7] ss:$0 sm:$0xff] }
  0x1d   :  { %183 = vmatpush.bf16.msra.mxu1 %v361_v32  ;;  %v451_v7 = vld [vmem:[%s588_s5] ss:$0 sm:$0xff] }
  0x1e   :  { %v452_v8 = vld [vmem:[%s589_s6] ss:$0 sm:$0xff] }
  0x1f   :  { %171 = vmatpush.bf16.msra.mxu0 %v349_v28 }
  0x20   :  { %292 = vmatpush.bf16.msra.mxu2 %v437_v38 }
  0x21   :  { %184 = vmatpush.bf16.msra.mxu1 %v353_v39 }
  0x23   :  { %172 = vmatpush.bf16.msra.mxu0 %v341_v35 }
  0x24   :  { %293 = vmatpush.bf16.msra.mxu2 %v436_v45 }
  0x25   :  { %185 = vmatpush.bf16.msra.mxu1 %v345_v46 }
  0x27   :  { %173 = vmatpush.bf16.msra.mxu0 %v333_v42 }
  0x28   :  { %294 = vmatpush.bf16.msra.mxu2 %v435_v53 }
  0x29   :  { %186 = vmatpush.bf16.msra.mxu1 %v337_v52 }
  0x2b   :  { %174 = vmatpush.bf16.msra.mxu0 %v325_v47 }
  0x2c   :  { %295 = vmatpush.bf16.msra.mxu2 %v434_v57 }
  0x2d   :  { %187 = vmatpush.bf16.msra.mxu1 %v329_v56 }
  0x2e   :  { %175 = vmatmul.bf16.vlgmr.msra.gmra.mxu0 %v70_v49 }
  0x30   :  { %188 = vmatmul.bf16.vlgmr.msra.gmra.mxu1 %v70_v49 }
  0xab   :  { %v176_v60 = vpop.f32.mrf.mxu0 }
  0xac   :  { %v206_v61 = vmul.f32 %v448_v58, %v176_v60 }
  0xad   :  { %v189_v3 = vpop.f32.mrf.mxu1 }
  0xae   :  { %v211_v62 = vadd.f32 %v449_v59, %v206_v61  ;;  %v219_v6 = vadd.f32 %v450_v5, %v189_v3 }
  0xb0   :  { %vm212_vm0 = vcmp.ge.f32.partialorder %v211_v62, 0.0  ;;  %v213_v63 = vmul.f32 0.2, %v211_v62  ;;  %v221_v9 = vmul.f32 0.2, %v219_v6  ;;  %vm220_vm1 = vcmp.ge.f32.partialorder %v219_v6, 0.0 }
  0xb2   :  { %v214_v0 = vsel %vm212_vm0, %v211_v62, %v213_v63  ;;  %v222_v13 = vsel %vm220_vm1, %v219_v6, %v221_v9 }
  0xb3   :  { %v178_v1 = vpop.f32.mrf.mxu0  ;;  %v223_v2 = vpack.c.bf16 %v214_v0, %v214_v0 }
  0xb5   :  { %296 = vmatmul.bf16.vlgmr.msra.gmra.mxu2 %v223_v2  ;;  %v191_v4 = vpop.f32.mrf.mxu1 }
 0x138   :  { %v297_v10 = vpop.f32.mrf.mxu2 }
 0x139   :  { %v305_v11 = vmul.f32 %v451_v7, %v297_v10 }
 0x13b   :  { %v310_v12 = vadd.f32 %v452_v8, %v305_v11 }
 0x13d   :  { %v311_v14 = vadd.f32 %v310_v12, %v222_v13 }
 0x13f   :  { %vm312_vm2 = vcmp.ge.f32.partialorder %v311_v14, 0.0  ;;  %v313_v15 = vmul.f32 0.2, %v311_v14 }
 0x140   :  { %v299_v16 = vpop.f32.mrf.mxu2 }
 0x141   :  { %v314_v17 = vsel %vm312_vm2, %v311_v14, %v313_v15 }
 0x142   :  { %315 = vst [vmem:[%s591_s8] sm:$0xff] %v314_v17 }
 0x143   :  { %320 = vsyncpa [#allocation4], 1 }
 0x144   :  { %321 = vsyncpa [#allocation6], 1 }

// kernel: _lambda_.7
= control target key start
LH: loop header
LB: loop body
LE: loop exit
PB: predicated region body
PF: predicated region fallthrough
CT: control target
= control target key end

     0   :  { %s1391_s0 = inlined_call_operand.vmem [shape: f32[8,256], index: 0, kind: input, shape index: {}]   ;;  %s1392_s1 = inlined_call_operand.hbm [shape: bf16[256,256], index: 1, kind: input, shape index: {}]   ;;  %s1393_s2 = inlined_call_operand.hbm [shape: bf16[128,128], index: 2, kind: input, shape index: {}]   ;;  %s1394_s3 = inlined_call_operand.vmem [shape: f32[1,128], index: 3, kind: input, shape index: {}]   ;;  %s1395_s4 = inlined_call_operand.vmem [shape: f32[1,128], index: 4, kind: input, shape index: {}]   ;;  %s1396_s5 = inlined_call_operand.vmem [shape: f32[1,128], index: 5, kind: input, shape index: {}]   ;;  %s1397_s6 = inlined_call_operand.vmem [shape: f32[1,128], index: 6, kind: input, shape index: {}]   ;;  %s1398_s7 = inlined_call_operand.vmem [shape: f32[1,128], index: 7, kind: input, shape index: {}]   ;;  %s1399_s8 = inlined_call_operand.vmem [shape: bf16[128,128], index: 8, kind: input, shape index: {}]   ;;  %s1400_s9 = inlined_call_operand.vmem [shape: f32[1,128], index: 9, kind: input, shape index: {}]   ;;  %s1401_s10 = inlined_call_operand.vmem [shape: f32[8,128], index: 10, kind: output, shape index: {}]  }
   0x1   :  { %1402 = sst [smem:[#allocation9_spill]] %s1393_s2 }
   0x2   :  { %1403 = sst [smem:[#allocation10_spill]] %s1400_s9 }
   0x3   :  { %1404 = sst [smem:[#allocation11_spill]] %s1401_s10 }
   0x4   :  { %15 = vsyncpa [#allocation4], 0 }
   0x5   :  { %17 = vsyncpa [#allocation4 + $0x1], 0 }
   0x6   :  { %18 = vsyncpa [#allocation6], 0  ;;  %s1202_s13 = smov 0   ;;  %s1204_s14 = smov 0  }
   0x7   :  { %s1206_s15 = smov 0   ;;  %s1208_s16 = smov 0  }
   0x8 LB: > { %s1221_s17 = sadd.s32 4294967295, %s1139_s16   ;;  %p70_p0 = scmp.ne.s32.totalorder %s1131_s14, %s1127_s13  ;;  %s1139_s16 = sphi %s1208_s16, %s1414_s16   ;;  %s1135_s15 = sphi %s1206_s15, %s1413_s15   ;;  %s1131_s14 = sphi %s1204_s14, %s1412_s14   ;;  %s1127_s13 = sphi %s1202_s13, %s1411_s13  }
   0x9   : > { %p71_p1 = scmp.eq.s32.totalorder %s1221_s17, 0  ;;  %p803_p2 = scmp.ge.s32.totalorder %s1139_s16, 1 }
   0xa   : > { %p270_p3 = scmp.lt.s32.totalorder %s1139_s16, 3  ;;  %p804_p4 = scmp.ne.s32.totalorder %s1221_s17, 0 }
   0xb   : > { %p1230_p5 = por %p71_p1, %p70_p0  ;;  %s1406_s2 = sld [smem:[#allocation9_spill]] }
   0xc   : > { %p1237_p6 = pnand %p803_p2, %p270_p3  ;;  %s1141_s23 = smov [#allocation5]  }
   0xd   : > { %s283_s24 = sshll.u32 %s1141_s23, 4  ;;  %s1246_s25 = sadd.s32 1, %s1139_s16   ;;  %s284_s24 = int_to_ptr.vmem [resolvable:$true] %s283_s24 }
   0xe   : > { %p986_p7 = pneg %p1237_p6  ;;  %s1142_s26 = smov 64  }
   0xf   : > { %s1143_s27 = smov 4   ;;  %s54_s28 = ssub.s32 %s1139_s16, %s1246_s25 }
  0x10   : > { %p987_p8 = pnand %p986_p7, %p71_p1  ;;  %s57_s29 = sadd.s32 1, %s1135_s15 }
  0x11   : > { %s281_s21 = sshll.u32 %s1406_s2, 4  ;;  %p55_p9 = scmp.eq.s32.totalorder %s54_s28, 0  ;;  %s282_s21 = int_to_ptr.hbm [resolvable:$true] %s281_s21 }
  0x12   : > { %989 = dma.hbm_to_vmem [thread:$0]  (!%p987_p8), %s282_s21, 1024, %s284_s24, [#allocation6], %s1142_s26, %s1142_s26, %s1143_s27  }
  0x13   : > { %p64_p10 = scmp.ne.s32.totalorder %s1135_s15, %s1131_s14  ;;  %p65_p11 = scmp.eq.s32.totalorder %s1139_s16, 0 }
  0x14   : > { %p995_p12 = scmp.lt.s32.totalorder %s1139_s16, 2  ;;  %s325_s11 = sand.u32 1, %s1135_s15  }
  0x15   : > { %s1256_s30 = scalar_select %p55_p9, %s1135_s15, %s57_s29  }
  0x16   : > { %p66_p13 = por %p65_p11, %p64_p10  ;;  %s806_s12 = sshll.u32 %s325_s11, 7 }
  0x17   : > { %s947_s13 = sshll.u32 %s1139_s16, 7  ;;  %s329_s2 = scalar_lea.vmem [#allocation3], %s806_s12 }
  0x18   : > { %s335_s23 = scalar_lea.hbm %s1392_s1, %s947_s13  ;;  %s338_s10 = sshll.u32 %s329_s2, 4  ;;  %s339_s10 = int_to_ptr.vmem [resolvable:$true] %s338_s10 }
  0x19   : > { %s336_s9 = sshll.u32 %s335_s23, 4  ;;  %p1263_p0 = pnand %p995_p12, %p66_p13  ;;  %s337_s9 = int_to_ptr.hbm [resolvable:$true] %s336_s9 }
  0x1a   : > { %s326_s24 = scalar_lea.sflag [#allocation4], %s325_s11  ;;  %s1071_s26 = sshra.s32 %s337_s9, 4  ;;  %s1072_s26 = int_to_ptr.hbm [resolvable:$true] %s1071_s26 }
  0x1b   : > { %s1073_s27 = scalar_lea.hbm %s1072_s26, 128  ;;  %p1075_p3 = pneg %p1263_p0 }
  0x1c   : > { %p1074_p2 = scmp.ne.s32.totalorder %s1072_s26, %s1073_s27  ;;  %s1078_s2 = scalar_lea.hbm %s1392_s1, 256 }
  0x1d   : > { %p1079_p9 = scmp.lt.s32.totalorder %s1072_s26, %s1392_s1  ;;  %p1080_p10 = scmp.lt.s32.totalorder %s1078_s2, %s1073_s27 }
  0x1e   : > { %p1076_p7 = pnand %p1075_p3, %p1074_p2 }
  0x1f   : > { %p1081_p11 = por %p1080_p10, %p1079_p9 }
  0x20   : > { %p1077_p8 = pneg %p1076_p7 }
  0x22   : > { %p1082_p12 = pnand %p1081_p11, %p1077_p8 }
  0x24   : > { %1085 = shalt.err (!%p1082_p12)
}
  0x25   : > { %s1144_s11 = smov 128   ;;  %s1145_s13 = smov 8  }
  0x26   : > { %993 = dma.hbm_to_vmem [thread:$0]  (!%p1263_p0), %s337_s9, 2048, %s339_s10, %s326_s24, %s1144_s11, %s1144_s11, %s1145_s13  }
  0x27   : > { %350 = sbr.rel (%p1237_p6) target bundleno = 528 (0x210), region = 60  ;;  %s352_s19 = sand.u32 (!%p1237_p6), 1, %s1131_s14  }
  0x28   : > { %s811_s20 = sshll.u32 (!%p1237_p6), %s352_s19, 7  ;;  %s353_s23 = scalar_lea.sflag (!%p1237_p6), [#allocation4], %s352_s19 }
  0x29   : > { %s1280_s16 = scalar_lea.vmem (!%p1237_p6), [#allocation3], %s811_s20 }
  0x2c   : > { %1118 = dma.done.wait (%p1230_p5), %s353_s23, 2048  }
  0x2d   : > { %1120 = vsyncadd (%p1230_p5), %s353_s23, 4294965248 }
  0x2e   : > { %1122 = dma.done.wait (%p71_p1), [#allocation6], 1024  }
  0x2f   : > { %1124 = vsyncadd (%p71_p1), [#allocation6], 4294966272  ;;  %p398_p6 = scmp.lt.s32.totalorder %s1221_s17, 1 }
  0x30   : > { %406 = sbr.rel (%p804_p4) target bundleno = 56 (0x38), region = 72 }
  0x31   : > { %s399_s9 = scalar_select %p398_p6, %s1221_s17, 1 }
  0x33   : > { %s813_s10 = sshll.u32 %s399_s9, 3 }
  0x34   : > { %s1295_s24 = scalar_lea.vmem %s1391_s0, %s813_s10 }
  0x35   : > { %v1146_v0 = vmov 0.0  }
  0x36   : > { %407 = vst [vmem:[#allocation2] sm:$0xff] %v1146_v0 }
  0x37   : > { %408 = vst [vmem:[#allocation2 + $0x8] sm:$0xff] %v1146_v0 }
  0x38 PF: > { %v873_v1 = vld [vmem:[%s1280_s16 + $0x70] sm:$0xf]  ;;  %v963_v2 = vld [vmem:[%s1280_s16 + $0x74] sm:$0xf0]  ;;  %v962_v3 = vld [vmem:[%s1280_s16 + $0x74] sm:$0xf] }
  0x39   : > { %v874_v4 = vor.u32 %v963_v2, %v873_v1  ;;  %v875_v5 = vld [vmem:[%s1280_s16 + $0x78] sm:$0xf0]  ;;  %v865_v6 = vld [vmem:[%s1280_s16 + $0x60] sm:$0xf]  ;;  %v961_v7 = vld [vmem:[%s1280_s16 + $0x64] sm:$0xf0] }
  0x3a   : > { %v878_v8 = vor.u32 %v962_v3, %v875_v5  ;;  %v960_v9 = vld [vmem:[%s1280_s16 + $0x64] sm:$0xf]  ;;  %v867_v10 = vld [vmem:[%s1280_s16 + $0x68] sm:$0xf0]  ;;  %v866_v11 = vor.u32 %v961_v7, %v865_v6  ;;  %v857_v13 = vld [vmem:[%s1280_s16 + $0x50] sm:$0xf] }
  0x3b   : > { %509 = vmatpush.bf16.msra.mxu0 %v874_v4  ;;  %v870_v12 = vor.u32 %v960_v9, %v867_v10  ;;  %v959_v14 = vld [vmem:[%s1280_s16 + $0x54] sm:$0xf0]  ;;  %v958_v15 = vld [vmem:[%s1280_s16 + $0x54] sm:$0xf]  ;;  %v859_v16 = vld [vmem:[%s1280_s16 + $0x58] sm:$0xf0] }
  0x3c   : > { %522 = vmatpush.bf16.msra.mxu1 %v878_v8  ;;  %v858_v17 = vor.u32 %v959_v14, %v857_v13  ;;  %v862_v18 = vor.u32 %v958_v15, %v859_v16  ;;  %v849_v19 = vld [vmem:[%s1280_s16 + $0x40] sm:$0xf]  ;;  %v957_v20 = vld [vmem:[%s1280_s16 + $0x44] sm:$0xf0]  ;;  %v956_v21 = vld [vmem:[%s1280_s16 + $0x44] sm:$0xf] }
  0x3d   : > { %v851_v22 = vld [vmem:[%s1280_s16 + $0x48] sm:$0xf0]  ;;  %v850_v23 = vor.u32 %v957_v20, %v849_v19  ;;  %v841_v25 = vld [vmem:[%s1280_s16 + $0x30] sm:$0xf]  ;;  %v955_v26 = vld [vmem:[%s1280_s16 + $0x34] sm:$0xf0] }
  0x3e   : > { %v854_v24 = vor.u32 %v956_v21, %v851_v22  ;;  %v954_v27 = vld [vmem:[%s1280_s16 + $0x34] sm:$0xf]  ;;  %v843_v28 = vld [vmem:[%s1280_s16 + $0x38] sm:$0xf0]  ;;  %v842_v29 = vor.u32 %v955_v26, %v841_v25  ;;  %v833_v31 = vld [vmem:[%s1280_s16 + $0x20] sm:$0xf] }
  0x3f   : > { %510 = vmatpush.bf16.msra.mxu0 %v866_v11  ;;  %v846_v30 = vor.u32 %v954_v27, %v843_v28  ;;  %v953_v32 = vld [vmem:[%s1280_s16 + $0x24] sm:$0xf0]  ;;  %v952_v33 = vld [vmem:[%s1280_s16 + $0x24] sm:$0xf]  ;;  %v835_v34 = vld [vmem:[%s1280_s16 + $0x28] sm:$0xf0] }
  0x40   : > { %523 = vmatpush.bf16.msra.mxu1 %v870_v12  ;;  %v834_v35 = vor.u32 %v953_v32, %v833_v31  ;;  %v838_v36 = vor.u32 %v952_v33, %v835_v34  ;;  %v825_v37 = vld [vmem:[%s1280_s16 + $0x10] sm:$0xf]  ;;  %v951_v38 = vld [vmem:[%s1280_s16 + $0x14] sm:$0xf0]  ;;  %v950_v39 = vld [vmem:[%s1280_s16 + $0x14] sm:$0xf] }
  0x41   : > { %v827_v40 = vld [vmem:[%s1280_s16 + $0x18] sm:$0xf0]  ;;  %v826_v41 = vor.u32 %v951_v38, %v825_v37  ;;  %v817_v43 = vld [vmem:[%s1280_s16] sm:$0xf]  ;;  %v949_v44 = vld [vmem:[%s1280_s16 + $0x4] sm:$0xf0] }
  0x42   : > { %v830_v42 = vor.u32 %v950_v39, %v827_v40  ;;  %v948_v45 = vld [vmem:[%s1280_s16 + $0x4] sm:$0xf]  ;;  %v819_v46 = vld [vmem:[%s1280_s16 + $0x8] sm:$0xf0]  ;;  %v818_v47 = vor.u32 %v949_v44, %v817_v43  ;;  %v411_v48 = vld [vmem:[%s1295_s24] sm:$0xff]  ;;  %p879_p1 = scmp.ne.s32.totalorder %s1221_s17, 1 }
  0x43   : > { %511 = vmatpush.bf16.msra.mxu0 %v858_v17  ;;  %v822_v49 = vor.u32 %v948_v45, %v819_v46  ;;  %v412_v50 = vpack.c.bf16 %v411_v48, %v411_v48  ;;  %v409_v51 = vld [vmem:[#allocation2] sm:$0xff]  ;;  %v410_v52 = vld [vmem:[#allocation2 + $0x8] sm:$0xff]  ;;  %s1409_s13 = sld [smem:[#allocation10_spill]] (!%p879_p1) }
  0x44   : > { %524 = vmatpush.bf16.msra.mxu1 %v862_v18  ;;  %s1410_s23 = sld [smem:[#allocation11_spill]] (!%p879_p1) }
  0x47   : > { %512 = vmatpush.bf16.msra.mxu0 %v850_v23 }
  0x48   : > { %525 = vmatpush.bf16.msra.mxu1 %v854_v24 }
  0x4b   : > { %513 = vmatpush.bf16.msra.mxu0 %v842_v29 }
  0x4c   : > { %526 = vmatpush.bf16.msra.mxu1 %v846_v30 }
  0x4f   : > { %514 = vmatpush.bf16.msra.mxu0 %v834_v35 }
  0x50   : > { %527 = vmatpush.bf16.msra.mxu1 %v838_v36 }
  0x53   : > { %515 = vmatpush.bf16.msra.mxu0 %v826_v41 }
  0x54   : > { %528 = vmatpush.bf16.msra.mxu1 %v830_v42 }
  0x57   : > { %516 = vmatpush.bf16.msra.mxu0 %v818_v47 }
  0x58   : > { %529 = vmatpush.bf16.msra.mxu1 %v822_v49 }
  0x5a   : > { %517 = vmatmul.bf16.vlgmr.msra.gmra.mxu0 %v412_v50 }
  0x5b   : > { %530 = vmatmul.bf16.vlgmr.msra.gmra.mxu1 %v412_v50 }
  0xd7   : > { %v518_v53 = vpop.f32.mrf.mxu0 }
  0xd8   : > { %v535_v54 = vadd.f32 %v518_v53, %v409_v51  ;;  %v531_v55 = vpop.f32.mrf.mxu1 }
  0xd9   : > { %v536_v56 = vadd.f32 %v531_v55, %v410_v52 }
  0xda   : > { %537 = vst [vmem:[#allocation2] sm:$0xff] %v535_v54 }
  0xdb   : > { %538 = vst [vmem:[#allocation2 + $0x8] sm:$0xff] %v536_v56 }
  0xdc   : > { %542 = sbr.rel (%p879_p1) target bundleno = 528 (0x210), region = 76 }
  0xdf   : > { %v520_v57 = vpop.f32.mrf.mxu0 }
  0xe0   : > { %v533_v58 = vpop.f32.mrf.mxu1 }
  0xe1   : > { %v971_v59 = vld [vmem:[#allocation5 + $0x38] sm:$0xff]  ;;  %v970_v60 = vld [vmem:[#allocation5 + $0x30] sm:$0xff]  ;;  %v979_v61 = vld [vmem:[%s1399_s8 + $0x38] sm:$0xff] }
  0xe2   : > { %631 = vmatpush.bf16.msra.mxu0 %v971_v59  ;;  %v969_v62 = vld [vmem:[#allocation5 + $0x28] sm:$0xff]  ;;  %727 = vmatpush.bf16.msra.mxu1 %v979_v61  ;;  %v978_v63 = vld [vmem:[%s1399_s8 + $0x30] sm:$0xff]  ;;  %v1035_v1 = vld [vmem:[%s1394_s3] ss:$0 sm:$0xff] }
  0xe3   : > { %v968_v0 = vld [vmem:[#allocation5 + $0x20] sm:$0xff]  ;;  %v977_v2 = vld [vmem:[%s1399_s8 + $0x28] sm:$0xff]  ;;  %v543_v3 = vld [vmem:[#allocation2] sm:$0xff] }
  0xe4   : > { %v967_v4 = vld [vmem:[#allocation5 + $0x18] sm:$0xff]  ;;  %v549_v5 = vmul.f32 %v1035_v1, %v543_v3  ;;  %v1036_v6 = vld [vmem:[%s1395_s4] ss:$0 sm:$0xff]  ;;  %v975_v10 = vld [vmem:[%s1399_s8 + $0x18] sm:$0xff] }
  0xe5   : > { %v976_v7 = vld [vmem:[%s1399_s8 + $0x20] sm:$0xff]  ;;  %v965_v11 = vld [vmem:[#allocation5 + $0x8] sm:$0xff]  ;;  %v964_v13 = vld [vmem:[#allocation5] sm:$0xff] }
  0xe6   : > { %632 = vmatpush.bf16.msra.mxu0 %v970_v60  ;;  %728 = vmatpush.bf16.msra.mxu1 %v978_v63  ;;  %v966_v8 = vld [vmem:[#allocation5 + $0x10] sm:$0xff]  ;;  %v554_v9 = vadd.f32 %v1036_v6, %v549_v5  ;;  %v974_v16 = vld [vmem:[%s1399_s8 + $0x10] sm:$0xff]  ;;  %v973_v17 = vld [vmem:[%s1399_s8 + $0x8] sm:$0xff] }
  0xe7   : > { %v972_v18 = vld [vmem:[%s1399_s8] sm:$0xff]  ;;  %v544_v20 = vld [vmem:[#allocation2 + $0x8] sm:$0xff] }
  0xe8   : > { %v556_v12 = vmul.f32 0.2, %v554_v9  ;;  %vm555_vm0 = vcmp.ge.f32.partialorder %v554_v9, 0.0  ;;  %v1037_v19 = vld [vmem:[%s1398_s7] ss:$0 sm:$0xff] }
  0xe9   : > { %v562_v21 = vadd.f32 %v1037_v19, %v544_v20  ;;  %v1038_v22 = vld [vmem:[%s1396_s5] ss:$0 sm:$0xff] }
  0xea   : > { %633 = vmatpush.bf16.msra.mxu0 %v969_v62  ;;  %729 = vmatpush.bf16.msra.mxu1 %v977_v2  ;;  %v557_v14 = vsel %vm555_vm0, %v554_v9, %v556_v12  ;;  %v1039_v24 = vld [vmem:[%s1397_s6] ss:$0 sm:$0xff] }
  0xeb   : > { %v566_v15 = vpack.c.bf16 %v557_v14, %v557_v14  ;;  %v564_v23 = vmul.f32 0.2, %v562_v21  ;;  %vm563_vm1 = vcmp.ge.f32.partialorder %v562_v21, 0.0  ;;  %v1040_v34 = vld [vmem:[%s1409_s13] ss:$0 sm:$0xff] }
  0xed   : > { %v565_v27 = vsel %vm563_vm1, %v562_v21, %v564_v23 }
  0xee   : > { %634 = vmatpush.bf16.msra.mxu0 %v968_v0  ;;  %730 = vmatpush.bf16.msra.mxu1 %v976_v7 }
  0xf2   : > { %635 = vmatpush.bf16.msra.mxu0 %v967_v4  ;;  %731 = vmatpush.bf16.msra.mxu1 %v975_v10 }
  0xf6   : > { %636 = vmatpush.bf16.msra.mxu0 %v966_v8  ;;  %732 = vmatpush.bf16.msra.mxu1 %v974_v16 }
  0xfa   : > { %637 = vmatpush.bf16.msra.mxu0 %v965_v11  ;;  %733 = vmatpush.bf16.msra.mxu1 %v973_v17 }
  0xfe   : > { %638 = vmatpush.bf16.msra.mxu0 %v964_v13  ;;  %734 = vmatpush.bf16.msra.mxu1 %v972_v18 }
 0x101   : > { %639 = vmatmul.bf16.vlgmr.msra.gmra.mxu0 %v566_v15 }
 0x17e   : > { %v640_v25 = vpop.f32.mrf.mxu0 }
 0x17f   : > { %v648_v26 = vmul.f32 %v1038_v22, %v640_v25 }
 0x181   : > { %v653_v28 = vadd.f32 %v1039_v24, %v648_v26 }
 0x183   : > { %v654_v29 = vadd.f32 %v653_v28, %v565_v27 }
 0x185   : > { %vm655_vm2 = vcmp.ge.f32.partialorder %v654_v29, 0.0  ;;  %v656_v30 = vmul.f32 0.2, %v654_v29 }
 0x186   : > { %v642_v31 = vpop.f32.mrf.mxu0 }
 0x187   : > { %v657_v32 = vsel %vm655_vm2, %v654_v29, %v656_v30 }
 0x188   : > { %v658_v33 = vpack.c.bf16 %v657_v32, %v657_v32 }
 0x18a   : > { %735 = vmatmul.bf16.vlgmr.msra.gmra.mxu1 %v658_v33 }
 0x207   : > { %v736_v35 = vpop.f32.mrf.mxu1 }
 0x208   : > { %v737_v36 = vadd.f32 %v1040_v34, %v736_v35 }
 0x20a   : > { %740 = vst [vmem:[%s1410_s23] sm:$0xff] %v737_v36 }
 0x20f   : > { %v738_v37 = vpop.f32.mrf.mxu1 }
 0x210 PF: > { %p21_p4 = scmp.ge.s32.totalorder %s1246_s25, 4   ;;  %s1411_s13 = smov %s1131_s14 }
 0x211   : > { %s1412_s14 = smov %s1135_s15  ;;  %s1413_s15 = smov %s1256_s30 }
 0x212   : > { %s1414_s16 = smov %s1246_s25  ;;  %23 = sbr.rel (!%p21_p4) target bundleno = 8 (0x8), region = 111 }
 0x217   :  { %752 = vsyncpa [#allocation4], 1 }
 0x218   :  { %754 = vsyncpa [#allocation4 + $0x1], 1 }
 0x219   :  { %755 = vsyncpa [#allocation6], 1 }

// kernel: _lambda_.6
= control target key start
LH: loop header
LB: loop body
LE: loop exit
PB: predicated region body
PF: predicated region fallthrough
CT: control target
= control target key end

     0   :  { %13 = vsyncpa [#allocation4], 0  ;;  %s459_s30 = smov [#allocation3]   ;;  %s460_s10 = smov 64   ;;  %s627_s0 = inlined_call_operand.vmem [shape: f32[8,128], index: 0, kind: input, shape index: {}]   ;;  %s628_s1 = inlined_call_operand.vmem [shape: bf16[128,256], index: 1, kind: input, shape index: {}]   ;;  %s629_s2 = inlined_call_operand.hbm [shape: bf16[128,128], index: 2, kind: input, shape index: {}]   ;;  %s630_s3 = inlined_call_operand.vmem [shape: f32[1,128], index: 3, kind: input, shape index: {}]   ;;  %s631_s4 = inlined_call_operand.vmem [shape: f32[1,128], index: 4, kind: input, shape index: {}]   ;;  %s632_s5 = inlined_call_operand.vmem [shape: f32[1,128], index: 5, kind: input, shape index: {}]   ;;  %s633_s6 = inlined_call_operand.vmem [shape: f32[1,128], index: 6, kind: input, shape index: {}]   ;;  %s634_s7 = inlined_call_operand.vmem [shape: f32[1,128], index: 7, kind: input, shape index: {}]   ;;  %s635_s8 = inlined_call_operand.vmem [shape: f32[8,128], index: 8, kind: output, shape index: {}]  }
   0x1   :  { %s22_s29 = sshll.u32 %s629_s2, 4  ;;  %s24_s9 = sshll.u32 %s459_s30, 4  ;;  %s23_s29 = int_to_ptr.hbm [resolvable:$true] %s22_s29  ;;  %s25_s9 = int_to_ptr.vmem [resolvable:$true] %s24_s9 }
   0x2   :  { %s461_s11 = smov 4  }
   0x3   :  { %30 = dma.hbm_to_vmem [thread:$0]  %s23_s29, 1024, %s25_s9, [#allocation4], %s460_s10, %s460_s10, %s461_s11  }
   0x4   :  { %457 = dma.done.wait [#allocation4], 1024  }
   0x5   :  { %458 = vsyncadd [#allocation4], 4294966272  ;;  %v363_v0 = vld [vmem:[%s628_s1 + $0x70] sm:$0xf]  ;;  %v416_v1 = vld [vmem:[%s628_s1 + $0x74] sm:$0xf0] }
   0x6   :  { %v355_v2 = vld [vmem:[%s628_s1 + $0x60] sm:$0xf]  ;;  %v364_v3 = vor.u32 %v416_v1, %v363_v0  ;;  %v414_v4 = vld [vmem:[%s628_s1 + $0x64] sm:$0xf0]  ;;  %v347_v6 = vld [vmem:[%s628_s1 + $0x50] sm:$0xf] }
   0x7   :  { %v356_v5 = vor.u32 %v414_v4, %v355_v2  ;;  %v412_v7 = vld [vmem:[%s628_s1 + $0x54] sm:$0xf0]  ;;  %v415_v8 = vld [vmem:[%s628_s1 + $0x74] sm:$0xf]  ;;  %v365_v9 = vld [vmem:[%s628_s1 + $0x78] sm:$0xf0] }
   0x8   :  { %151 = vmatpush.bf16.msra.mxu0 %v364_v3  ;;  %v424_v10 = vld [vmem:[#allocation3 + $0x38] sm:$0xff]  ;;  %v413_v11 = vld [vmem:[%s628_s1 + $0x64] sm:$0xf]  ;;  %v348_v12 = vor.u32 %v412_v7, %v347_v6  ;;  %v368_v13 = vor.u32 %v415_v8, %v365_v9  ;;  %v357_v14 = vld [vmem:[%s628_s1 + $0x68] sm:$0xf0] }
   0x9   :  { %v339_v15 = vld [vmem:[%s628_s1 + $0x40] sm:$0xf]  ;;  %v410_v16 = vld [vmem:[%s628_s1 + $0x44] sm:$0xf0]  ;;  %272 = vmatpush.bf16.msra.mxu2 %v424_v10  ;;  %v423_v17 = vld [vmem:[#allocation3 + $0x30] sm:$0xff]  ;;  %v360_v18 = vor.u32 %v413_v11, %v357_v14 }
   0xa   :  { %164 = vmatpush.bf16.msra.mxu1 %v368_v13  ;;  %v331_v19 = vld [vmem:[%s628_s1 + $0x30] sm:$0xf]  ;;  %v411_v20 = vld [vmem:[%s628_s1 + $0x54] sm:$0xf]  ;;  %v349_v21 = vld [vmem:[%s628_s1 + $0x58] sm:$0xf0]  ;;  %v340_v22 = vor.u32 %v410_v16, %v339_v15 }
   0xb   :  { %v408_v23 = vld [vmem:[%s628_s1 + $0x34] sm:$0xf0]  ;;  %v422_v24 = vld [vmem:[#allocation3 + $0x28] sm:$0xff]  ;;  %v352_v25 = vor.u32 %v411_v20, %v349_v21  ;;  %v409_v26 = vld [vmem:[%s628_s1 + $0x44] sm:$0xf] }
   0xc   :  { %152 = vmatpush.bf16.msra.mxu0 %v356_v5  ;;  %v341_v27 = vld [vmem:[%s628_s1 + $0x48] sm:$0xf0]  ;;  %v332_v28 = vor.u32 %v408_v23, %v331_v19  ;;  %v323_v29 = vld [vmem:[%s628_s1 + $0x20] sm:$0xf]  ;;  %v406_v30 = vld [vmem:[%s628_s1 + $0x24] sm:$0xf0] }
   0xd   :  { %273 = vmatpush.bf16.msra.mxu2 %v423_v17  ;;  %v421_v31 = vld [vmem:[#allocation3 + $0x20] sm:$0xff]  ;;  %v344_v32 = vor.u32 %v409_v26, %v341_v27  ;;  %v407_v33 = vld [vmem:[%s628_s1 + $0x34] sm:$0xf]  ;;  %v333_v34 = vld [vmem:[%s628_s1 + $0x38] sm:$0xf0]  ;;  %v324_v35 = vor.u32 %v406_v30, %v323_v29 }
   0xe   :  { %165 = vmatpush.bf16.msra.mxu1 %v360_v18  ;;  %v315_v36 = vld [vmem:[%s628_s1 + $0x10] sm:$0xf]  ;;  %v404_v37 = vld [vmem:[%s628_s1 + $0x14] sm:$0xf0]  ;;  %v336_v39 = vor.u32 %v407_v33, %v333_v34  ;;  %v405_v40 = vld [vmem:[%s628_s1 + $0x24] sm:$0xf] }
   0xf   :  { %v420_v38 = vld [vmem:[#allocation3 + $0x18] sm:$0xff]  ;;  %v325_v41 = vld [vmem:[%s628_s1 + $0x28] sm:$0xf0]  ;;  %v316_v42 = vor.u32 %v404_v37, %v315_v36  ;;  %v307_v43 = vld [vmem:[%s628_s1] sm:$0xf] }
  0x10   :  { %153 = vmatpush.bf16.msra.mxu0 %v348_v12  ;;  %v402_v44 = vld [vmem:[%s628_s1 + $0x4] sm:$0xf0]  ;;  %v419_v45 = vld [vmem:[#allocation3 + $0x10] sm:$0xff]  ;;  %v328_v46 = vor.u32 %v405_v40, %v325_v41  ;;  %v53_v48 = vld [vmem:[%s627_s0] sm:$0xff] }
  0x11   :  { %274 = vmatpush.bf16.msra.mxu2 %v422_v24  ;;  %v308_v47 = vor.u32 %v402_v44, %v307_v43  ;;  %v54_v49 = vpack.c.bf16 %v53_v48, %v53_v48  ;;  %v403_v50 = vld [vmem:[%s628_s1 + $0x14] sm:$0xf]  ;;  %v317_v51 = vld [vmem:[%s628_s1 + $0x18] sm:$0xf0]  ;;  %v418_v53 = vld [vmem:[#allocation3 + $0x8] sm:$0xff] }
  0x12   :  { %166 = vmatpush.bf16.msra.mxu1 %v352_v25  ;;  %v320_v52 = vor.u32 %v403_v50, %v317_v51  ;;  %v401_v54 = vld [vmem:[%s628_s1 + $0x4] sm:$0xf]  ;;  %v309_v55 = vld [vmem:[%s628_s1 + $0x8] sm:$0xf0]  ;;  %v428_v58 = vld [vmem:[%s630_s3] ss:$0 sm:$0xff] }
  0x13   :  { %v312_v56 = vor.u32 %v401_v54, %v309_v55  ;;  %v417_v57 = vld [vmem:[#allocation3] sm:$0xff] }
  0x14   :  { %154 = vmatpush.bf16.msra.mxu0 %v340_v22  ;;  %v429_v59 = vld [vmem:[%s631_s4] ss:$0 sm:$0xff] }
  0x15   :  { %275 = vmatpush.bf16.msra.mxu2 %v421_v31  ;;  %v430_v5 = vld [vmem:[%s634_s7] ss:$0 sm:$0xff] }
  0x16   :  { %167 = vmatpush.bf16.msra.mxu1 %v344_v32  ;;  %v431_v7 = vld [vmem:[%s632_s5] ss:$0 sm:$0xff] }
  0x17   :  { %v432_v8 = vld [vmem:[%s633_s6] ss:$0 sm:$0xff] }
  0x18   :  { %155 = vmatpush.bf16.msra.mxu0 %v332_v28 }
  0x19   :  { %276 = vmatpush.bf16.msra.mxu2 %v420_v38 }
  0x1a   :  { %168 = vmatpush.bf16.msra.mxu1 %v336_v39 }
  0x1c   :  { %156 = vmatpush.bf16.msra.mxu0 %v324_v35 }
  0x1d   :  { %277 = vmatpush.bf16.msra.mxu2 %v419_v45 }
  0x1e   :  { %169 = vmatpush.bf16.msra.mxu1 %v328_v46 }
  0x20   :  { %157 = vmatpush.bf16.msra.mxu0 %v316_v42 }
  0x21   :  { %278 = vmatpush.bf16.msra.mxu2 %v418_v53 }
  0x22   :  { %170 = vmatpush.bf16.msra.mxu1 %v320_v52 }
  0x24   :  { %158 = vmatpush.bf16.msra.mxu0 %v308_v47 }
  0x25   :  { %279 = vmatpush.bf16.msra.mxu2 %v417_v57 }
  0x26   :  { %171 = vmatpush.bf16.msra.mxu1 %v312_v56 }
  0x27   :  { %159 = vmatmul.bf16.vlgmr.msra.gmra.mxu0 %v54_v49 }
  0x29   :  { %172 = vmatmul.bf16.vlgmr.msra.gmra.mxu1 %v54_v49 }
  0xa4   :  { %v160_v60 = vpop.f32.mrf.mxu0 }
  0xa5   :  { %v190_v61 = vmul.f32 %v428_v58, %v160_v60 }
  0xa6   :  { %v173_v3 = vpop.f32.mrf.mxu1 }
  0xa7   :  { %v195_v62 = vadd.f32 %v429_v59, %v190_v61  ;;  %v203_v6 = vadd.f32 %v430_v5, %v173_v3 }
  0xa9   :  { %vm196_vm0 = vcmp.ge.f32.partialorder %v195_v62, 0.0  ;;  %v197_v63 = vmul.f32 0.2, %v195_v62  ;;  %v205_v9 = vmul.f32 0.2, %v203_v6  ;;  %vm204_vm1 = vcmp.ge.f32.partialorder %v203_v6, 0.0 }
  0xab   :  { %v198_v0 = vsel %vm196_vm0, %v195_v62, %v197_v63  ;;  %v206_v13 = vsel %vm204_vm1, %v203_v6, %v205_v9 }
  0xac   :  { %v162_v1 = vpop.f32.mrf.mxu0  ;;  %v207_v2 = vpack.c.bf16 %v198_v0, %v198_v0 }
  0xae   :  { %280 = vmatmul.bf16.vlgmr.msra.gmra.mxu2 %v207_v2  ;;  %v175_v4 = vpop.f32.mrf.mxu1 }
 0x131   :  { %v281_v10 = vpop.f32.mrf.mxu2 }
 0x132   :  { %v289_v11 = vmul.f32 %v431_v7, %v281_v10 }
 0x134   :  { %v294_v12 = vadd.f32 %v432_v8, %v289_v11 }
 0x136   :  { %v295_v14 = vadd.f32 %v294_v12, %v206_v13 }
 0x138   :  { %vm296_vm2 = vcmp.ge.f32.partialorder %v295_v14, 0.0  ;;  %v297_v15 = vmul.f32 0.2, %v295_v14 }
 0x139   :  { %v283_v16 = vpop.f32.mrf.mxu2 }
 0x13a   :  { %v298_v17 = vsel %vm296_vm2, %v295_v14, %v297_v15 }
 0x13b   :  { %299 = vst [vmem:[%s635_s8] sm:$0xff] %v298_v17 }
 0x13c   :  { %304 = vsyncpa [#allocation4], 1 }

</bundles_post_ra>
